<compile_context>
chip_gen: v5e
topology: v5e:2x2
jax: 0.10.0
libtpu: 0.0.40
codegen_flags: <defaults>
</compile_context>

<pallas_src>
import functools
import math

import jax
import jax.numpy as jnp
from jax.experimental import pallas as pl
from jax.experimental.pallas import tpu as pltpu


# ----------------------------------------------------------------------------
# Kernel: one grid step == one (batch, layer) pair.  h is carried in scratch.
# ----------------------------------------------------------------------------
def _epa_kernel(x_ref, valid_ref,
                wqkv_ref, bqkv_ref, wo_ref, bo_ref, ln1w_ref, ln1b_ref,
                w1_ref, b1_ref, w2_ref, b2_ref, ln2w_ref, ln2b_ref,
                wout_ref, bout_ref,
                out_ref,
                h_ref,
                *, num_heads):
    f32 = jnp.float32
    bf16 = jnp.bfloat16
    S, H = h_ref.shape
    nh = num_heads
    hd = H // nh
    eps = 1e-5
    l = pl.program_id(1)

    # --- initialize the carried activations from the input at the first layer
    @pl.when(l == 0)
    def _():
        h_ref[...] = x_ref[0].astype(f32)

    valid = valid_ref[0]                                        # (1, S), 1.0 = keep
    addmask = jnp.where(valid > 0.5, 0.0, -1e9).astype(f32)     # key-padding mask

    def layer_norm(y, w, b):
        # two-pass statistics (numerically safer than E[x^2]-E[x]^2)
        mu = jnp.mean(y, axis=-1, keepdims=True)
        d = y - mu
        var = jnp.mean(d * d, axis=-1, keepdims=True)
        return d * jax.lax.rsqrt(var + eps) * w + b

    h = h_ref[...]                                              # (S, H) f32

    # --- fused QKV: single lane-dense (S,H)x(H,3H) MXU matmul (bf16 in, f32 acc)
    qkv = jnp.dot(h.astype(bf16), wqkv_ref[0],
                  preferred_element_type=f32) + bqkv_ref[0]     # (S, 3H) f32

    def split_heads(m):                                         # (S,H) -> (nh,S,hd)
        return m.reshape(S, nh, hd).transpose(1, 0, 2)

    q = split_heads(qkv[:, :H]).astype(bf16)        # 1/sqrt(hd) folded into Wq/bq
    k = split_heads(qkv[:, H:2 * H]).astype(bf16)
    v = split_heads(qkv[:, 2 * H:]).astype(bf16)

    # --- per-batch (S,S) attention, heads batched on the leading axis
    s = jnp.einsum('nqd,nkd->nqk', q, k, preferred_element_type=f32)  # (nh,S,S)
    s = s + addmask[None]                                       # mask padded keys
    s = s - jnp.max(s, axis=-1, keepdims=True)
    p = jnp.exp(s)
    p = p * pl.reciprocal(jnp.sum(p, axis=-1, keepdims=True), approx=True)

    o = jnp.einsum('nqk,nkd->nqd', p.astype(bf16), v,
                   preferred_element_type=f32)                  # (nh, S, hd)

    # --- output projection: merge heads, ONE (S,H)x(H,H) lane-dense matmul
    o_flat = o.transpose(1, 0, 2).reshape(S, H)
    attn = jnp.dot(o_flat.astype(bf16), wo_ref[0],
                   preferred_element_type=f32) + bo_ref[0]      # (S, H)

    # --- residual + LN1, feed-forward (ReLU) + residual + LN2 (post-norm layer)
    y = layer_norm(h + attn, ln1w_ref[0], ln1b_ref[0])
    ff = jnp.dot(y.astype(bf16), w1_ref[0], preferred_element_type=f32) + b1_ref[0]
    ff = jnp.maximum(ff, 0.0)
    ff = jnp.dot(ff.astype(bf16), w2_ref[0], preferred_element_type=f32) + b2_ref[0]
    h_new = layer_norm(y + ff, ln2w_ref[0], ln2b_ref[0])
    h_ref[...] = h_new

    # --- masked-mean output head fused as the last-layer epilogue (exact divide)
    @pl.when(l == pl.num_programs(1) - 1)
    def _():
        pooled = jnp.dot(valid, h_new, preferred_element_type=f32)         # (1, H)
        score = jnp.dot(pooled, wout_ref[...], preferred_element_type=f32)  # (1, 1)
        den = jnp.maximum(jnp.sum(valid, axis=-1, keepdims=True), 1.0)
        out_ref[0] = (score / den + bout_ref[...]).astype(out_ref.dtype)


# ----------------------------------------------------------------------------
# Wrapper: grid over (batch, layer), per-layer weight streaming via index_map.
# ----------------------------------------------------------------------------
def epa_forward(x, attn_mask, fused_params, num_heads):
    """x: (B, S, H) f32; attn_mask: (B, S) f32 with 1.0 == padded position."""
    B, S, H = x.shape
    (wqkv, bqkv, wo, bo, ln1w, ln1b, w1, b1,
     w2, b2, ln2w, ln2b, wout, bout) = fused_params
    L = wqkv.shape[0]
    dff = w1.shape[2]

    valid = (1.0 - attn_mask).astype(jnp.float32).reshape(B, 1, S)   # 1.0 = keep

    def wmap(b, l):            # per-layer weight block, streamed/double-buffered
        return (l, 0, 0)

    in_specs = [
        pl.BlockSpec((1, S, H), lambda b, l: (b, 0, 0)),      # x (per batch)
        pl.BlockSpec((1, 1, S), lambda b, l: (b, 0, 0)),      # key-validity row
        pl.BlockSpec((1, H, 3 * H), wmap),                    # wqkv
        pl.BlockSpec((1, 1, 3 * H), wmap),                    # bqkv
        pl.BlockSpec((1, H, H), wmap),                        # wo
        pl.BlockSpec((1, 1, H), wmap),                        # bo
        pl.BlockSpec((1, 1, H), wmap),                        # ln1w
        pl.BlockSpec((1, 1, H), wmap),                        # ln1b
        pl.BlockSpec((1, H, dff), wmap),                      # w1
        pl.BlockSpec((1, 1, dff), wmap),                      # b1
        pl.BlockSpec((1, dff, H), wmap),                      # w2
        pl.BlockSpec((1, 1, H), wmap),                        # b2
        pl.BlockSpec((1, 1, H), wmap),                        # ln2w
        pl.BlockSpec((1, 1, H), wmap),                        # ln2b
        pl.BlockSpec((H, 1), lambda b, l: (0, 0)),            # wout (resident)
        pl.BlockSpec((1, 1), lambda b, l: (0, 0)),            # bout (resident)
    ]

    out = pl.pallas_call(
        functools.partial(_epa_kernel, num_heads=num_heads),
        out_shape=jax.ShapeDtypeStruct((B, 1, 1), jnp.float32),
        grid=(B, L),
        in_specs=in_specs,
        out_specs=pl.BlockSpec((1, 1, 1), lambda b, l: (b, 0, 0)),
        scratch_shapes=[pltpu.VMEM((S, H), jnp.float32)],     # carried activations
        compiler_params=pltpu.CompilerParams(
            dimension_semantics=("parallel", "arbitrary"),
            vmem_limit_bytes=32 * 1024 * 1024,
        ),
    )(x, valid, *fused_params)
    return out[:, 0, 0]


# ----------------------------------------------------------------------------
# Deterministic parameter init (PyTorch-Linear-style uniform bounds) and the
# host-side fused layout: stacked (L, ...) weights, bf16 MXU operands, softmax
# scale folded into the Q projection.
# ----------------------------------------------------------------------------
def init_params(key, hidden_dim, dim_ff, num_layers):
    def lin(k, fan_in, fan_out):
        k1, k2 = jax.random.split(k)
        bound = 1.0 / math.sqrt(fan_in)
        w = jax.random.uniform(k1, (fan_in, fan_out), jnp.float32, -bound, bound)
        b = jax.random.uniform(k2, (1, fan_out), jnp.float32, -bound, bound)
        return w, b

    keys = jax.random.split(key, num_layers + 1)
    layers = []
    for l in range(num_layers):
        lk = jax.random.split(keys[l], 4)
        wqkv, bqkv = lin(lk[0], hidden_dim, 3 * hidden_dim)   # (in, out) layout
        wo, bo = lin(lk[1], hidden_dim, hidden_dim)
        w1, b1 = lin(lk[2], hidden_dim, dim_ff)
        w2, b2 = lin(lk[3], dim_ff, hidden_dim)
        ln1w = jnp.ones((1, hidden_dim), jnp.float32)
        ln1b = jnp.zeros((1, hidden_dim), jnp.float32)
        ln2w = jnp.ones((1, hidden_dim), jnp.float32)
        ln2b = jnp.zeros((1, hidden_dim), jnp.float32)
        layers.append((wqkv, bqkv, wo, bo, ln1w, ln1b, w1, b1, w2, b2, ln2w, ln2b))
    wout, bout = lin(keys[-1], hidden_dim, 1)
    return layers, (wout, bout)


def prepare_fused_params(layers, head, num_heads):
    H = layers[0][0].shape[0]
    hd = H // num_heads
    bf16 = jnp.bfloat16

    def stack(i):
        return jnp.stack([lp[i] for lp in layers])

    wqkv, bqkv = stack(0), stack(1)                       # (L, H, 3H), (L, 1, 3H)
    # fold the 1/sqrt(hd) softmax scale into the Q projection (weight + bias)
    scale = 1.0 / math.sqrt(hd)
    wqkv = wqkv.at[:, :, :H].multiply(scale)
    bqkv = bqkv.at[:, :, :H].multiply(scale)

    wo, bo = stack(2), stack(3)                           # (L, H, H), (L, 1, H)
    ln1w, ln1b = stack(4), stack(5)
    w1, b1 = stack(6), stack(7)                           # (L, H, dff), (L, 1, dff)
    w2, b2 = stack(8), stack(9)                           # (L, dff, H), (L, 1, H)
    ln2w, ln2b = stack(10), stack(11)
    wout, bout = head                                     # (H, 1), (1, 1)
    return (wqkv.astype(bf16), bqkv, wo.astype(bf16), bo, ln1w, ln1b,
            w1.astype(bf16), b1, w2.astype(bf16), b2, ln2w, ln2b, wout, bout)


if __name__ == "__main__":
    B, S, H, NUM_HEADS, DIM_FF, NUM_LAYERS = 2, 8, 32, 4, 64, 2

    key = jax.random.PRNGKey(0)
    kx, kp = jax.random.split(key)
    x = jax.random.normal(kx, (B, S, H), jnp.float32)

    # attn_mask: 1.0 marks padded positions (second sample has length 5)
    lengths = jnp.array([8, 5])
    attn_mask = (jnp.arange(S)[None, :] >= lengths[:, None]).astype(jnp.float32)

    layers, head = init_params(kp, H, DIM_FF, NUM_LAYERS)
    fused_params = prepare_fused_params(layers, head, NUM_HEADS)

    fwd = jax.jit(functools.partial(epa_forward, num_heads=NUM_HEADS))
    out = fwd(x, attn_mask, fused_params)
    out = jax.block_until_ready(out)

    assert out.shape == (B,), out.shape
    assert bool(jnp.all(jnp.isfinite(out)))
    print("KERNEL_OK")
</pallas_src>

<mosaic_0001>
module attributes {stable_mosaic.version = 11 : i64} {
  func.func @_epa_kernel(%arg0: i32, %arg1: i32, %arg2: memref<1x8x32xf32, #tpu.memory_space<vmem>>, %arg3: memref<1x1x8xf32, #tpu.memory_space<vmem>>, %arg4: memref<1x32x96xbf16, #tpu.memory_space<vmem>>, %arg5: memref<1x1x96xf32, #tpu.memory_space<vmem>>, %arg6: memref<1x32x32xbf16, #tpu.memory_space<vmem>>, %arg7: memref<1x1x32xf32, #tpu.memory_space<vmem>>, %arg8: memref<1x1x32xf32, #tpu.memory_space<vmem>>, %arg9: memref<1x1x32xf32, #tpu.memory_space<vmem>>, %arg10: memref<1x32x64xbf16, #tpu.memory_space<vmem>>, %arg11: memref<1x1x64xf32, #tpu.memory_space<vmem>>, %arg12: memref<1x64x32xbf16, #tpu.memory_space<vmem>>, %arg13: memref<1x1x32xf32, #tpu.memory_space<vmem>>, %arg14: memref<1x1x32xf32, #tpu.memory_space<vmem>>, %arg15: memref<1x1x32xf32, #tpu.memory_space<vmem>>, %arg16: memref<32x1xf32, #tpu.memory_space<vmem>>, %arg17: memref<1x1xf32, #tpu.memory_space<vmem>>, %arg18: memref<1x1x1xf32, #tpu.memory_space<vmem>>, %arg19: memref<8x32xf32, #tpu.memory_space<vmem>>) attributes {dimension_semantics = [#tpu.dimension_semantics<parallel>, #tpu.dimension_semantics<arbitrary>], iteration_bounds = array<i64: 2, 2>, scalar_prefetch = 0 : i64, scratch_operands = 1 : i64, tpu.core_type = #tpu.core_type<tc>, window_params = [{transform_indices = @transform_0, window_bounds = array<i64: 1, 8, 32>}, {transform_indices = @transform_1, window_bounds = array<i64: 1, 1, 8>}, {transform_indices = @transform_2, window_bounds = array<i64: 1, 32, 96>}, {transform_indices = @transform_3, window_bounds = array<i64: 1, 1, 96>}, {transform_indices = @transform_4, window_bounds = array<i64: 1, 32, 32>}, {transform_indices = @transform_5, window_bounds = array<i64: 1, 1, 32>}, {transform_indices = @transform_6, window_bounds = array<i64: 1, 1, 32>}, {transform_indices = @transform_7, window_bounds = array<i64: 1, 1, 32>}, {transform_indices = @transform_8, window_bounds = array<i64: 1, 32, 64>}, {transform_indices = @transform_9, window_bounds = array<i64: 1, 1, 64>}, {transform_indices = @transform_10, window_bounds = array<i64: 1, 64, 32>}, {transform_indices = @transform_11, window_bounds = array<i64: 1, 1, 32>}, {transform_indices = @transform_12, window_bounds = array<i64: 1, 1, 32>}, {transform_indices = @transform_13, window_bounds = array<i64: 1, 1, 32>}, {pipeline_mode = #tpu.pipeline_mode<synchronous>, transform_indices = @transform_14, window_bounds = array<i64: 32, 1>}, {pipeline_mode = #tpu.pipeline_mode<synchronous>, transform_indices = @transform_15, window_bounds = array<i64: 1, 1>}, {transform_indices = @transform_16, window_bounds = array<i64: 1, 1, 1>}]} {
    %c0_i32 = arith.constant 0 : i32
    %0 = arith.cmpi eq, %arg1, %c0_i32 : i32
    %1 = arith.extui %0 : i1 to i32
    %c0_i32_0 = arith.constant 0 : i32
    %2 = arith.cmpi ne, %1, %c0_i32_0 : i32
    scf.if %2 {
      %c0_65 = arith.constant 0 : index
      %c0_66 = arith.constant 0 : index
      %c0_67 = arith.constant 0 : index
      %129 = vector.load %arg2[%c0_65, %c0_66, %c0_67] : memref<1x8x32xf32, #tpu.memory_space<vmem>>, vector<1x8x32xf32>
      %130 = vector.shape_cast %129 : vector<1x8x32xf32> to vector<8x32xf32>
      %c0_68 = arith.constant 0 : index
      %c0_69 = arith.constant 0 : index
      %131 = vector.load %arg19[%c0_68, %c0_69] : memref<8x32xf32, #tpu.memory_space<vmem>>, vector<8x32xf32>
      tpu.vector_store %arg19[%c0_68, %c0_69], %130 {strides = array<i32>} : memref<8x32xf32, #tpu.memory_space<vmem>>, vector<8x32xf32>,
    } else {
    }
    %c0 = arith.constant 0 : index
    %c0_1 = arith.constant 0 : index
    %c0_2 = arith.constant 0 : index
    %3 = vector.load %arg3[%c0, %c0_1, %c0_2] : memref<1x1x8xf32, #tpu.memory_space<vmem>>, vector<1x1x8xf32>
    %4 = vector.shape_cast %3 : vector<1x1x8xf32> to vector<1x8xf32>
    %cst = arith.constant 5.000000e-01 : f32
    %5 = vector.broadcast %cst : f32 to vector<1x8xf32>
    %6 = arith.cmpf ogt, %4, %5 : vector<1x8xf32>
    %cst_3 = arith.constant 0.000000e+00 : f32
    %cst_4 = arith.constant -1.000000e+09 : f32
    %7 = vector.broadcast %cst_3 : f32 to vector<1x8xf32>
    %8 = vector.broadcast %cst_4 : f32 to vector<1x8xf32>
    %9 = arith.select %6, %7, %8 : vector<1x8xi1>, vector<1x8xf32>
    %c0_5 = arith.constant 0 : index
    %c0_6 = arith.constant 0 : index
    %10 = vector.load %arg19[%c0_5, %c0_6] : memref<8x32xf32, #tpu.memory_space<vmem>>, vector<8x32xf32>
    %11 = arith.truncf %10 : vector<8x32xf32> to vector<8x32xbf16>
    %c0_7 = arith.constant 0 : index
    %c0_8 = arith.constant 0 : index
    %c0_9 = arith.constant 0 : index
    %12 = vector.load %arg4[%c0_7, %c0_8, %c0_9] : memref<1x32x96xbf16, #tpu.memory_space<vmem>>, vector<1x32x96xbf16>
    %13 = vector.shape_cast %12 : vector<1x32x96xbf16> to vector<32x96xbf16>
    %cst_10 = arith.constant dense<0.000000e+00> : vector<8x96xf32>
    %14 = tpu.matmul %11, %13, %cst_10 {dimension_numbers = #tpu.dot_dimension_numbers<[1], [0], [0], [1], [0, 0, 1, 1], [], []>} : vector<8x32xbf16>, vector<32x96xbf16>, vector<8x96xf32> -> vector<8x96xf32>
    %c0_11 = arith.constant 0 : index
    %c0_12 = arith.constant 0 : index
    %c0_13 = arith.constant 0 : index
    %15 = vector.load %arg5[%c0_11, %c0_12, %c0_13] : memref<1x1x96xf32, #tpu.memory_space<vmem>>, vector<1x1x96xf32>
    %16 = vector.shape_cast %15 : vector<1x1x96xf32> to vector<1x96xf32>
    %17 = vector.broadcast %16 : vector<1x96xf32> to vector<8x96xf32>
    %18 = arith.addf %14, %17 : vector<8x96xf32>
    %19 = vector.extract_strided_slice %18 {offsets = [0, 0], sizes = [8, 32], strides = [1, 1]} : vector<8x96xf32> to vector<8x32xf32>
    %20 = vector.shape_cast %19 : vector<8x32xf32> to vector<8x4x8xf32>
    %21 = tpu.transpose %20, [1, 0, 2] : vector<8x4x8xf32> -> vector<4x8x8xf32>
    %22 = arith.truncf %21 : vector<4x8x8xf32> to vector<4x8x8xbf16>
    %23 = vector.extract_strided_slice %18 {offsets = [0, 32], sizes = [8, 32], strides = [1, 1]} : vector<8x96xf32> to vector<8x32xf32>
    %24 = vector.shape_cast %23 : vector<8x32xf32> to vector<8x4x8xf32>
    %25 = tpu.transpose %24, [1, 0, 2] : vector<8x4x8xf32> -> vector<4x8x8xf32>
    %26 = arith.truncf %25 : vector<4x8x8xf32> to vector<4x8x8xbf16>
    %27 = vector.extract_strided_slice %18 {offsets = [0, 64], sizes = [8, 32], strides = [1, 1]} : vector<8x96xf32> to vector<8x32xf32>
    %28 = vector.shape_cast %27 : vector<8x32xf32> to vector<8x4x8xf32>
    %29 = tpu.transpose %28, [1, 0, 2] : vector<8x4x8xf32> -> vector<4x8x8xf32>
    %30 = arith.truncf %29 : vector<4x8x8xf32> to vector<4x8x8xbf16>
    "tpu.trace_start"() <{level = 10 : i32, message = "nqd,nkd->nqk"}> : () -> ()
    %cst_14 = arith.constant dense<0.000000e+00> : vector<4x8x8xf32>
    %31 = tpu.matmul %22, %26, %cst_14 {dimension_numbers = #tpu.dot_dimension_numbers<[2], [2], [1], [1], [0, 0, 0, 1, 1, 1], [0], [0]>} : vector<4x8x8xbf16>, vector<4x8x8xbf16>, vector<4x8x8xf32> -> vector<4x8x8xf32>
    "tpu.trace_stop"() : () -> ()
    %32 = vector.shape_cast %9 : vector<1x8xf32> to vector<1x1x8xf32>
    %33 = vector.broadcast %32 : vector<1x1x8xf32> to vector<4x8x8xf32>
    %34 = arith.addf %31, %33 : vector<4x8x8xf32>
    %cst_15 = arith.constant dense<0xFF800000> : vector<4x8xf32>
    %35 = vector.multi_reduction <maximumf>, %34, %cst_15 [2] : vector<4x8x8xf32> to vector<4x8xf32>
    %36 = vector.shape_cast %35 : vector<4x8xf32> to vector<4x8x1xf32>
    %37 = vector.broadcast %36 : vector<4x8x1xf32> to vector<4x8x8xf32>
    %38 = arith.subf %34, %37 : vector<4x8x8xf32>
    %39 = math.exp %38 : vector<4x8x8xf32>
    %cst_16 = arith.constant dense<0.000000e+00> : vector<4x8xf32>
    %40 = vector.multi_reduction <add>, %39, %cst_16 [2] : vector<4x8x8xf32> to vector<4x8xf32>
    %41 = vector.shape_cast %40 : vector<4x8xf32> to vector<4x8x1xf32>
    %42 = tpu.reciprocal %41 {approx = true} : vector<4x8x1xf32> -> vector<4x8x1xf32>
    %43 = vector.broadcast %42 : vector<4x8x1xf32> to vector<4x8x8xf32>
    %44 = arith.mulf %39, %43 : vector<4x8x8xf32>
    %45 = arith.truncf %44 : vector<4x8x8xf32> to vector<4x8x8xbf16>
    "tpu.trace_start"() <{level = 10 : i32, message = "nqk,nkd->nqd"}> : () -> ()
    %cst_17 = arith.constant dense<0.000000e+00> : vector<4x8x8xf32>
    %46 = tpu.matmul %45, %30, %cst_17 {dimension_numbers = #tpu.dot_dimension_numbers<[2], [1], [1], [2], [0, 0, 0, 1, 1, 2], [0], [0]>} : vector<4x8x8xbf16>, vector<4x8x8xbf16>, vector<4x8x8xf32> -> vector<4x8x8xf32>
    "tpu.trace_stop"() : () -> ()
    %47 = tpu.transpose %46, [1, 0, 2] : vector<4x8x8xf32> -> vector<8x4x8xf32>
    %48 = vector.shape_cast %47 : vector<8x4x8xf32> to vector<8x32xf32>
    %49 = arith.truncf %48 : vector<8x32xf32> to vector<8x32xbf16>
    %c0_18 = arith.constant 0 : index
    %c0_19 = arith.constant 0 : index
    %c0_20 = arith.constant 0 : index
    %50 = vector.load %arg6[%c0_18, %c0_19, %c0_20] : memref<1x32x32xbf16, #tpu.memory_space<vmem>>, vector<1x32x32xbf16>
    %51 = vector.shape_cast %50 : vector<1x32x32xbf16> to vector<32x32xbf16>
    %cst_21 = arith.constant dense<0.000000e+00> : vector<8x32xf32>
    %52 = tpu.matmul %49, %51, %cst_21 {dimension_numbers = #tpu.dot_dimension_numbers<[1], [0], [0], [1], [0, 0, 1, 1], [], []>} : vector<8x32xbf16>, vector<32x32xbf16>, vector<8x32xf32> -> vector<8x32xf32>
    %c0_22 = arith.constant 0 : index
    %c0_23 = arith.constant 0 : index
    %c0_24 = arith.constant 0 : index
    %53 = vector.load %arg7[%c0_22, %c0_23, %c0_24] : memref<1x1x32xf32, #tpu.memory_space<vmem>>, vector<1x1x32xf32>
    %54 = vector.shape_cast %53 : vector<1x1x32xf32> to vector<1x32xf32>
    %55 = vector.broadcast %54 : vector<1x32xf32> to vector<8x32xf32>
    %56 = arith.addf %52, %55 : vector<8x32xf32>
    %57 = arith.addf %10, %56 : vector<8x32xf32>
    %c0_25 = arith.constant 0 : index
    %c0_26 = arith.constant 0 : index
    %c0_27 = arith.constant 0 : index
    %58 = vector.load %arg8[%c0_25, %c0_26, %c0_27] : memref<1x1x32xf32, #tpu.memory_space<vmem>>, vector<1x1x32xf32>
    %59 = vector.shape_cast %58 : vector<1x1x32xf32> to vector<1x32xf32>
    %c0_28 = arith.constant 0 : index
    %c0_29 = arith.constant 0 : index
    %c0_30 = arith.constant 0 : index
    %60 = vector.load %arg9[%c0_28, %c0_29, %c0_30] : memref<1x1x32xf32, #tpu.memory_space<vmem>>, vector<1x1x32xf32>
    %61 = vector.shape_cast %60 : vector<1x1x32xf32> to vector<1x32xf32>
    %cst_31 = arith.constant dense<0.000000e+00> : vector<8xf32>
    %62 = vector.multi_reduction <add>, %57, %cst_31 [1] : vector<8x32xf32> to vector<8xf32>
    %63 = vector.shape_cast %62 : vector<8xf32> to vector<8x1xf32>
    %cst_32 = arith.constant 3.200000e+01 : f32
    %64 = vector.broadcast %cst_32 : f32 to vector<8x1xf32>
    %65 = arith.divf %63, %64 : vector<8x1xf32>
    %66 = vector.broadcast %65 : vector<8x1xf32> to vector<8x32xf32>
    %67 = arith.subf %57, %66 : vector<8x32xf32>
    %68 = arith.mulf %67, %67 : vector<8x32xf32>
    %cst_33 = arith.constant dense<0.000000e+00> : vector<8xf32>
    %69 = vector.multi_reduction <add>, %68, %cst_33 [1] : vector<8x32xf32> to vector<8xf32>
    %70 = vector.shape_cast %69 : vector<8xf32> to vector<8x1xf32>
    %cst_34 = arith.constant 3.200000e+01 : f32
    %71 = vector.broadcast %cst_34 : f32 to vector<8x1xf32>
    %72 = arith.divf %70, %71 : vector<8x1xf32>
    %cst_35 = arith.constant 9.99999974E-6 : f32
    %73 = vector.broadcast %cst_35 : f32 to vector<8x1xf32>
    %74 = arith.addf %72, %73 : vector<8x1xf32>
    %75 = math.rsqrt %74 : vector<8x1xf32>
    %76 = vector.broadcast %75 : vector<8x1xf32> to vector<8x32xf32>
    %77 = arith.mulf %67, %76 : vector<8x32xf32>
    %78 = vector.broadcast %59 : vector<1x32xf32> to vector<8x32xf32>
    %79 = arith.mulf %77, %78 : vector<8x32xf32>
    %80 = vector.broadcast %61 : vector<1x32xf32> to vector<8x32xf32>
    %81 = arith.addf %79, %80 : vector<8x32xf32>
    %82 = arith.truncf %81 : vector<8x32xf32> to vector<8x32xbf16>
    %c0_36 = arith.constant 0 : index
    %c0_37 = arith.constant 0 : index
    %c0_38 = arith.constant 0 : index
    %83 = vector.load %arg10[%c0_36, %c0_37, %c0_38] : memref<1x32x64xbf16, #tpu.memory_space<vmem>>, vector<1x32x64xbf16>
    %84 = vector.shape_cast %83 : vector<1x32x64xbf16> to vector<32x64xbf16>
    %cst_39 = arith.constant dense<0.000000e+00> : vector<8x64xf32>
    %85 = tpu.matmul %82, %84, %cst_39 {dimension_numbers = #tpu.dot_dimension_numbers<[1], [0], [0], [1], [0, 0, 1, 1], [], []>} : vector<8x32xbf16>, vector<32x64xbf16>, vector<8x64xf32> -> vector<8x64xf32>
    %c0_40 = arith.constant 0 : index
    %c0_41 = arith.constant 0 : index
    %c0_42 = arith.constant 0 : index
    %86 = vector.load %arg11[%c0_40, %c0_41, %c0_42] : memref<1x1x64xf32, #tpu.memory_space<vmem>>, vector<1x1x64xf32>
    %87 = vector.shape_cast %86 : vector<1x1x64xf32> to vector<1x64xf32>
    %88 = vector.broadcast %87 : vector<1x64xf32> to vector<8x64xf32>
    %89 = arith.addf %85, %88 : vector<8x64xf32>
    %cst_43 = arith.constant 0.000000e+00 : f32
    %90 = vector.broadcast %cst_43 : f32 to vector<8x64xf32>
    %91 = arith.maximumf %89, %90 : vector<8x64xf32>
    %92 = arith.truncf %91 : vector<8x64xf32> to vector<8x64xbf16>
    %c0_44 = arith.constant 0 : index
    %c0_45 = arith.constant 0 : index
    %c0_46 = arith.constant 0 : index
    %93 = vector.load %arg12[%c0_44, %c0_45, %c0_46] : memref<1x64x32xbf16, #tpu.memory_space<vmem>>, vector<1x64x32xbf16>
    %94 = vector.shape_cast %93 : vector<1x64x32xbf16> to vector<64x32xbf16>
    %cst_47 = arith.constant dense<0.000000e+00> : vector<8x32xf32>
    %95 = tpu.matmul %92, %94, %cst_47 {dimension_numbers = #tpu.dot_dimension_numbers<[1], [0], [0], [1], [0, 0, 1, 1], [], []>} : vector<8x64xbf16>, vector<64x32xbf16>, vector<8x32xf32> -> vector<8x32xf32>
    %c0_48 = arith.constant 0 : index
    %c0_49 = arith.constant 0 : index
    %c0_50 = arith.constant 0 : index
    %96 = vector.load %arg13[%c0_48, %c0_49, %c0_50] : memref<1x1x32xf32, #tpu.memory_space<vmem>>, vector<1x1x32xf32>
    %97 = vector.shape_cast %96 : vector<1x1x32xf32> to vector<1x32xf32>
    %98 = vector.broadcast %97 : vector<1x32xf32> to vector<8x32xf32>
    %99 = arith.addf %95, %98 : vector<8x32xf32>
    %100 = arith.addf %81, %99 : vector<8x32xf32>
    %c0_51 = arith.constant 0 : index
    %c0_52 = arith.constant 0 : index
    %c0_53 = arith.constant 0 : index
    %101 = vector.load %arg14[%c0_51, %c0_52, %c0_53] : memref<1x1x32xf32, #tpu.memory_space<vmem>>, vector<1x1x32xf32>
    %102 = vector.shape_cast %101 : vector<1x1x32xf32> to vector<1x32xf32>
    %c0_54 = arith.constant 0 : index
    %c0_55 = arith.constant 0 : index
    %c0_56 = arith.constant 0 : index
    %103 = vector.load %arg15[%c0_54, %c0_55, %c0_56] : memref<1x1x32xf32, #tpu.memory_space<vmem>>, vector<1x1x32xf32>
    %104 = vector.shape_cast %103 : vector<1x1x32xf32> to vector<1x32xf32>
    %cst_57 = arith.constant dense<0.000000e+00> : vector<8xf32>
    %105 = vector.multi_reduction <add>, %100, %cst_57 [1] : vector<8x32xf32> to vector<8xf32>
    %106 = vector.shape_cast %105 : vector<8xf32> to vector<8x1xf32>
    %cst_58 = arith.constant 3.200000e+01 : f32
    %107 = vector.broadcast %cst_58 : f32 to vector<8x1xf32>
    %108 = arith.divf %106, %107 : vector<8x1xf32>
    %109 = vector.broadcast %108 : vector<8x1xf32> to vector<8x32xf32>
    %110 = arith.subf %100, %109 : vector<8x32xf32>
    %111 = arith.mulf %110, %110 : vector<8x32xf32>
    %cst_59 = arith.constant dense<0.000000e+00> : vector<8xf32>
    %112 = vector.multi_reduction <add>, %111, %cst_59 [1] : vector<8x32xf32> to vector<8xf32>
    %113 = vector.shape_cast %112 : vector<8xf32> to vector<8x1xf32>
    %cst_60 = arith.constant 3.200000e+01 : f32
    %114 = vector.broadcast %cst_60 : f32 to vector<8x1xf32>
    %115 = arith.divf %113, %114 : vector<8x1xf32>
    %cst_61 = arith.constant 9.99999974E-6 : f32
    %116 = vector.broadcast %cst_61 : f32 to vector<8x1xf32>
    %117 = arith.addf %115, %116 : vector<8x1xf32>
    %118 = math.rsqrt %117 : vector<8x1xf32>
    %119 = vector.broadcast %118 : vector<8x1xf32> to vector<8x32xf32>
    %120 = arith.mulf %110, %119 : vector<8x32xf32>
    %121 = vector.broadcast %102 : vector<1x32xf32> to vector<8x32xf32>
    %122 = arith.mulf %120, %121 : vector<8x32xf32>
    %123 = vector.broadcast %104 : vector<1x32xf32> to vector<8x32xf32>
    %124 = arith.addf %122, %123 : vector<8x32xf32>
    %c0_62 = arith.constant 0 : index
    %c0_63 = arith.constant 0 : index
    %125 = vector.load %arg19[%c0_62, %c0_63] : memref<8x32xf32, #tpu.memory_space<vmem>>, vector<8x32xf32>
    tpu.vector_store %arg19[%c0_62, %c0_63], %124 {strides = array<i32>} : memref<8x32xf32, #tpu.memory_space<vmem>>, vector<8x32xf32>,
    %c1_i32 = arith.constant 1 : i32
    %126 = arith.cmpi eq, %arg1, %c1_i32 : i32
    %127 = arith.extui %126 : i1 to i32
    %c0_i32_64 = arith.constant 0 : i32
    %128 = arith.cmpi ne, %127, %c0_i32_64 : i32
    scf.if %128 {
      %cst_65 = arith.constant dense<0.000000e+00> : vector<1x32xf32>
      %129 = tpu.matmul %4, %124, %cst_65 {dimension_numbers = #tpu.dot_dimension_numbers<[1], [0], [0], [1], [0, 0, 1, 1], [], []>} : vector<1x8xf32>, vector<8x32xf32>, vector<1x32xf32> -> vector<1x32xf32>
      %c0_66 = arith.constant 0 : index
      %c0_67 = arith.constant 0 : index
      %130 = vector.load %arg16[%c0_66, %c0_67] : memref<32x1xf32, #tpu.memory_space<vmem>>, vector<32x1xf32>
      %cst_68 = arith.constant dense<0.000000e+00> : vector<1x1xf32>
      %131 = tpu.matmul %129, %130, %cst_68 {dimension_numbers = #tpu.dot_dimension_numbers<[1], [0], [0], [1], [0, 0, 1, 1], [], []>} : vector<1x32xf32>, vector<32x1xf32>, vector<1x1xf32> -> vector<1x1xf32>
      %cst_69 = arith.constant dense<0.000000e+00> : vector<1xf32>
      %132 = vector.multi_reduction <add>, %4, %cst_69 [1] : vector<1x8xf32> to vector<1xf32>
      %133 = vector.shape_cast %132 : vector<1xf32> to vector<1x1xf32>
      %cst_70 = arith.constant 1.000000e+00 : f32
      %134 = vector.broadcast %cst_70 : f32 to vector<1x1xf32>
      %135 = arith.maximumf %133, %134 : vector<1x1xf32>
      %136 = arith.divf %131, %135 : vector<1x1xf32>
      %c0_71 = arith.constant 0 : index
      %c0_72 = arith.constant 0 : index
      %137 = vector.load %arg17[%c0_71, %c0_72] : memref<1x1xf32, #tpu.memory_space<vmem>>, vector<1x1xf32>
      %138 = arith.addf %136, %137 : vector<1x1xf32>
      %c0_73 = arith.constant 0 : index
      %c0_74 = arith.constant 0 : index
      %c0_75 = arith.constant 0 : index
      %139 = vector.load %arg18[%c0_73, %c0_74, %c0_75] : memref<1x1x1xf32, #tpu.memory_space<vmem>>, vector<1x1x1xf32>
      %140 = vector.shape_cast %139 : vector<1x1x1xf32> to vector<1x1xf32>
      %141 = vector.shape_cast %138 : vector<1x1xf32> to vector<1x1x1xf32>
      tpu.vector_store %arg18[%c0_73, %c0_74, %c0_75], %141 {strides = array<i32>} : memref<1x1x1xf32, #tpu.memory_space<vmem>>, vector<1x1x1xf32>,
    } else {
    }
    return
  }
  func.func @transform_0(%arg0: i32, %arg1: i32) -> (i32, i32, i32) {
    %c0_i32 = arith.constant 0 : i32
    %c0_i32_0 = arith.constant 0 : i32
    %c0_i32_1 = arith.constant 0 : i32
    return %arg0, %c0_i32, %c0_i32_0 : i32, i32, i32
  }
  func.func @transform_1(%arg0: i32, %arg1: i32) -> (i32, i32, i32) {
    %c0_i32 = arith.constant 0 : i32
    %c0_i32_0 = arith.constant 0 : i32
    %c0_i32_1 = arith.constant 0 : i32
    return %arg0, %c0_i32, %c0_i32_0 : i32, i32, i32
  }
  func.func @transform_2(%arg0: i32, %arg1: i32) -> (i32, i32, i32) {
    %c0_i32 = arith.constant 0 : i32
    %c0_i32_0 = arith.constant 0 : i32
    %c0_i32_1 = arith.constant 0 : i32
    return %arg1, %c0_i32, %c0_i32_0 : i32, i32, i32
  }
  func.func @transform_3(%arg0: i32, %arg1: i32) -> (i32, i32, i32) {
    %c0_i32 = arith.constant 0 : i32
    %c0_i32_0 = arith.constant 0 : i32
    %c0_i32_1 = arith.constant 0 : i32
    return %arg1, %c0_i32, %c0_i32_0 : i32, i32, i32
  }
  func.func @transform_4(%arg0: i32, %arg1: i32) -> (i32, i32, i32) {
    %c0_i32 = arith.constant 0 : i32
    %c0_i32_0 = arith.constant 0 : i32
    %c0_i32_1 = arith.constant 0 : i32
    return %arg1, %c0_i32, %c0_i32_0 : i32, i32, i32
  }
  func.func @transform_5(%arg0: i32, %arg1: i32) -> (i32, i32, i32) {
    %c0_i32 = arith.constant 0 : i32
    %c0_i32_0 = arith.constant 0 : i32
    %c0_i32_1 = arith.constant 0 : i32
    return %arg1, %c0_i32, %c0_i32_0 : i32, i32, i32
  }
  func.func @transform_6(%arg0: i32, %arg1: i32) -> (i32, i32, i32) {
    %c0_i32 = arith.constant 0 : i32
    %c0_i32_0 = arith.constant 0 : i32
    %c0_i32_1 = arith.constant 0 : i32
    return %arg1, %c0_i32, %c0_i32_0 : i32, i32, i32
  }
  func.func @transform_7(%arg0: i32, %arg1: i32) -> (i32, i32, i32) {
    %c0_i32 = arith.constant 0 : i32
    %c0_i32_0 = arith.constant 0 : i32
    %c0_i32_1 = arith.constant 0 : i32
    return %arg1, %c0_i32, %c0_i32_0 : i32, i32, i32
  }
  func.func @transform_8(%arg0: i32, %arg1: i32) -> (i32, i32, i32) {
    %c0_i32 = arith.constant 0 : i32
    %c0_i32_0 = arith.constant 0 : i32
    %c0_i32_1 = arith.constant 0 : i32
    return %arg1, %c0_i32, %c0_i32_0 : i32, i32, i32
  }
  func.func @transform_9(%arg0: i32, %arg1: i32) -> (i32, i32, i32) {
    %c0_i32 = arith.constant 0 : i32
    %c0_i32_0 = arith.constant 0 : i32
    %c0_i32_1 = arith.constant 0 : i32
    return %arg1, %c0_i32, %c0_i32_0 : i32, i32, i32
  }
  func.func @transform_10(%arg0: i32, %arg1: i32) -> (i32, i32, i32) {
    %c0_i32 = arith.constant 0 : i32
    %c0_i32_0 = arith.constant 0 : i32
    %c0_i32_1 = arith.constant 0 : i32
    return %arg1, %c0_i32, %c0_i32_0 : i32, i32, i32
  }
  func.func @transform_11(%arg0: i32, %arg1: i32) -> (i32, i32, i32) {
    %c0_i32 = arith.constant 0 : i32
    %c0_i32_0 = arith.constant 0 : i32
    %c0_i32_1 = arith.constant 0 : i32
    return %arg1, %c0_i32, %c0_i32_0 : i32, i32, i32
  }
  func.func @transform_12(%arg0: i32, %arg1: i32) -> (i32, i32, i32) {
    %c0_i32 = arith.constant 0 : i32
    %c0_i32_0 = arith.constant 0 : i32
    %c0_i32_1 = arith.constant 0 : i32
    return %arg1, %c0_i32, %c0_i32_0 : i32, i32, i32
  }
  func.func @transform_13(%arg0: i32, %arg1: i32) -> (i32, i32, i32) {
    %c0_i32 = arith.constant 0 : i32
    %c0_i32_0 = arith.constant 0 : i32
    %c0_i32_1 = arith.constant 0 : i32
    return %arg1, %c0_i32, %c0_i32_0 : i32, i32, i32
  }
  func.func @transform_14(%arg0: i32, %arg1: i32) -> (i32, i32) {
    %c0_i32 = arith.constant 0 : i32
    %c0_i32_0 = arith.constant 0 : i32
    %c0_i32_1 = arith.constant 0 : i32
    return %c0_i32, %c0_i32_0 : i32, i32
  }
  func.func @transform_15(%arg0: i32, %arg1: i32) -> (i32, i32) {
    %c0_i32 = arith.constant 0 : i32
    %c0_i32_0 = arith.constant 0 : i32
    %c0_i32_1 = arith.constant 0 : i32
    return %c0_i32, %c0_i32_0 : i32, i32
  }
  func.func @transform_16(%arg0: i32, %arg1: i32) -> (i32, i32, i32) {
    %c0_i32 = arith.constant 0 : i32
    %c0_i32_0 = arith.constant 0 : i32
    %c0_i32_1 = arith.constant 0 : i32
    return %arg0, %c0_i32, %c0_i32_0 : i32, i32, i32
  }
}

</mosaic_0001>

<bundles_post_ra>
// kernel: epa_forward.1
= control target key start
LH: loop header
LB: loop body
LE: loop exit
PB: predicated region body
PF: predicated region fallthrough
CT: control target
= control target key end

     0   :  { %s3330_s0 = inlined_call_operand.vmem [shape: f32[2,8,32], index: 0, kind: input, shape index: {}]   ;;  %s3331_s1 = inlined_call_operand.vmem [shape: f32[2,1,8], index: 1, kind: input, shape index: {}]   ;;  %s3332_s2 = inlined_call_operand.vmem [shape: bf16[2,32,96], index: 2, kind: input, shape index: {}]   ;;  %s3333_s3 = inlined_call_operand.hbm [shape: f32[2,1,96], index: 3, kind: input, shape index: {}]   ;;  %s3334_s4 = inlined_call_operand.vmem [shape: bf16[2,32,32], index: 4, kind: input, shape index: {}]   ;;  %s3335_s5 = inlined_call_operand.hbm [shape: f32[2,1,32], index: 5, kind: input, shape index: {}]   ;;  %s3336_s6 = inlined_call_operand.hbm [shape: f32[2,1,32], index: 6, kind: input, shape index: {}]   ;;  %s3337_s7 = inlined_call_operand.hbm [shape: f32[2,1,32], index: 7, kind: input, shape index: {}]   ;;  %s3338_s8 = inlined_call_operand.vmem [shape: bf16[2,32,64], index: 8, kind: input, shape index: {}]   ;;  %s3339_s9 = inlined_call_operand.hbm [shape: f32[2,1,64], index: 9, kind: input, shape index: {}]   ;;  %s3340_s10 = inlined_call_operand.vmem [shape: bf16[2,64,32], index: 10, kind: input, shape index: {}]   ;;  %s3341_s11 = inlined_call_operand.hbm [shape: f32[2,1,32], index: 11, kind: input, shape index: {}]   ;;  %s3342_s12 = inlined_call_operand.vmem [shape: f32[2,1,32], index: 12, kind: input, shape index: {}]   ;;  %s3343_s13 = inlined_call_operand.hbm [shape: f32[2,1,32], index: 13, kind: input, shape index: {}]   ;;  %s3344_s14 = inlined_call_operand.vmem [shape: f32[32,1], index: 14, kind: input, shape index: {}]   ;;  %s3345_s15 = inlined_call_operand.<no memory space> [shape: f32[1,1], index: 15, kind: input, shape index: {}]   ;;  %s3346_s16 = inlined_call_operand.vmem [shape: f32[2,1,1], index: 16, kind: output, shape index: {}]  }
   0x1   :  { %3355 = sst [smem:[#allocation24_spill]] %s3330_s0  ;;  %v21_v0 = vstv %s3345_s15 }
   0x2   :  { %3356 = sst [smem:[#allocation25_spill]] %s3332_s2  ;;  %22 = vst [vmem:[#allocation3] sm:$0x1] %v21_v0 }
   0x3   :  { %3357 = sst [smem:[#allocation26_spill]] %s3333_s3 }
   0x4   :  { %3358 = sst [smem:[#allocation27_spill]] %s3334_s4 }
   0x5   :  { %3359 = sst [smem:[#allocation28_spill]] %s3335_s5 }
   0x6   :  { %3360 = sst [smem:[#allocation29_spill]] %s3336_s6 }
   0x7   :  { %3361 = sst [smem:[#allocation30_spill]] %s3337_s7 }
   0x8   :  { %3362 = sst [smem:[#allocation31_spill]] %s3338_s8 }
   0x9   :  { %3363 = sst [smem:[#allocation32_spill]] %s3339_s9 }
   0xa   :  { %3364 = sst [smem:[#allocation33_spill]] %s3340_s10 }
   0xb   :  { %3365 = sst [smem:[#allocation34_spill]] %s3341_s11 }
   0xc   :  { %3366 = sst [smem:[#allocation35_spill]] %s3342_s12 }
   0xd   :  { %3367 = sst [smem:[#allocation36_spill]] %s3344_s14 }
   0xe   :  { %3368 = sst [smem:[#allocation37_spill]] %s3346_s16 }
   0xf   :  { %23 = vsyncpa [#allocation5], 0 }
  0x10   :  { %25 = vsyncpa [#allocation5 + $0x1], 0 }
  0x11   :  { %26 = vsyncpa [#allocation7], 0 }
  0x12   :  { %28 = vsyncpa [#allocation7 + $0x1], 0 }
  0x13   :  { %29 = vsyncpa [#allocation10], 0 }
  0x14   :  { %31 = vsyncpa [#allocation10 + $0x1], 0 }
  0x15   :  { %32 = vsyncpa [#allocation13], 0 }
  0x16   :  { %34 = vsyncpa [#allocation13 + $0x1], 0  ;;  %s2803_s23 = smov 0   ;;  %s2805_s24 = smov 0  }
  0x17   :  { %s2807_s25 = smov 0   ;;  %s2809_s26 = smov 0  }
  0x18   :  { %s2811_s27 = smov 0   ;;  %s2813_s15 = smov 0  }
  0x19   :  { %s2815_s28 = smov 0   ;;  %s2817_s29 = smov 0  }
  0x1a LB: > { %3369 = sst [smem:[#allocation19_spill]] %s2681_s25  ;;  %s3347_s30 = sadd.s32 4294967295, %s2701_s29   ;;  %s2701_s29 = sphi %s2817_s29, %s40_s29   ;;  %s2697_s28 = sphi %s2815_s28, %s3408_s28   ;;  %s2693_s15 = sphi %s2813_s15, %s3412_s15   ;;  %s2689_s27 = sphi %s2811_s27, %s3406_s27   ;;  %s2685_s26 = sphi %s2809_s26, %s3411_s26   ;;  %s2681_s25 = sphi %s2807_s25, %s3405_s25   ;;  %s2677_s24 = sphi %s2805_s24, %s3410_s24   ;;  %s2673_s23 = sphi %s2803_s23, %s3409_s23  }
  0x1b   : > { %3370 = sst [smem:[#allocation20_spill]] %s2697_s28  ;;  %s49_s0 = sadd.s32 1, %s2693_s15 }
  0x1c   : > { %p50_p0 = scmp.ge.s32.totalorder %s49_s0, 2  ;;  %s52_s17 = sadd.s32 1, %s2697_s28 }
  0x1d   : > { %s137_s18 = sadd.s32 1, %s2681_s25  ;;  %p144_p1 = scmp.ne.s32.totalorder %s2681_s25, %s2677_s24 }
  0x1e   : > { %s3414_s0 = smov (%p50_p0, %s49_s0), 0  ;;  %s3416_s17 = smov (!%p50_p0, %s52_s17), %s2697_s28 }
  0x1f   : > { %3371 = sst [smem:[#allocation21_spill]] %s3414_s0  ;;  %s134_s19 = ssub.s32 %s2693_s15, %s3414_s0 }
  0x20   : > { %p145_p2 = scmp.eq.s32.totalorder %s2701_s29, 0  ;;  %p54_p3 = scmp.ge.s32.totalorder %s3416_s17, 2 }
  0x21   : > { %p135_p4 = scmp.eq.s32.totalorder %s134_s19, 0  ;;  %p150_p6 = scmp.ne.s32.totalorder %s2677_s24, %s2673_s23 }
  0x22   : > { %p146_p5 = por %p145_p2, %p144_p1  ;;  %s3418_s17 = smov (%p54_p3, %s3416_s17), 0 }
  0x23   : > { %3372 = sst [smem:[#allocation22_spill]] %s3418_s17  ;;  %p151_p7 = scmp.eq.s32.totalorder %s3347_s30, 0 }
  0x24   : > { %s2857_s20 = scalar_select %p135_p4, %s2681_s25, %s137_s18  }
  0x25   : > { %p2284_p8 = scmp.lt.s32.totalorder %s2701_s29, 4  ;;  %s2863_s21 = sand.u32 1, %s2681_s25  }
  0x26   : > { %3373 = sst [smem:[#allocation23_spill]] %s2857_s20  ;;  %p2865_p9 = por %p151_p7, %p150_p6 }
  0x27   : > { %s2870_s19 = sand.u32 1, %s2701_s29   ;;  %p2872_p10 = pnand %p2284_p8, %p146_p5 }
  0x28   : > { %s3376_s5 = sld [smem:[#allocation28_spill]]  ;;  %s557_s28 = scalar_lea.vmem [#allocation6], %s2863_s21 }
  0x29   : > { %s564_s20 = sshll.u32 %s557_s28, 4  ;;  %p2166_p11 = scmp.ge.s32.totalorder %s2701_s29, 1  ;;  %s565_s20 = int_to_ptr.vmem [resolvable:$true] %s564_s20 }
  0x2a   : > { %s3352_s25 = scalar_lea.sflag [#allocation7], %s2870_s19  ;;  %p676_p12 = scmp.lt.s32.totalorder %s2701_s29, 5 }
  0x2b   : > { %s3377_s7 = sld [smem:[#allocation30_spill]]  ;;  %s3354_s12 = scalar_lea.sflag [#allocation13], %s2870_s19 }
  0x2c   : > { %p2892_p13 = pnand %p2166_p11, %p676_p12  ;;  %s3379_s11 = sld [smem:[#allocation34_spill]] }
  0x2d   : > { %s3380_s3 = sld [smem:[#allocation26_spill]]  ;;  %s532_s14 = scalar_lea.vmem [#allocation4], %s2863_s21 }
  0x2e   : > { %s560_s17 = scalar_lea.hbm %s3376_s5, %s2693_s15  ;;  %s591_s5 = scalar_lea.vmem [#allocation9], %s2863_s21 }
  0x2f   : > { %s562_s0 = sshll.u32 %s560_s17, 4  ;;  %s598_s16 = sshll.u32 %s591_s5, 4  ;;  %s563_s0 = int_to_ptr.hbm [resolvable:$true] %s562_s0  ;;  %s599_s16 = int_to_ptr.vmem [resolvable:$true] %s598_s16 }
  0x30   : > { %2268 = dma.hbm_to_vmem [thread:$0]  (!%p2872_p10), %s563_s0, 16, %s565_s20, %s3352_s25  }
  0x31   : > { %s594_s17 = scalar_lea.hbm %s3377_s7, %s2693_s15  ;;  %s3353_s0 = scalar_lea.sflag [#allocation10], %s2870_s19 }
  0x32   : > { %s596_s28 = sshll.u32 %s594_s17, 4  ;;  %s644_s30 = scalar_lea.hbm %s3379_s11, %s2693_s15  ;;  %s597_s28 = int_to_ptr.hbm [resolvable:$true] %s596_s28 }
  0x33   : > { %2274 = dma.hbm_to_vmem [thread:$0]  (!%p2872_p10), %s597_s28, 16, %s599_s16, %s3353_s0  }
  0x34   : > { %s646_s25 = sshll.u32 %s644_s30, 4  ;;  %s641_s7 = scalar_lea.vmem [#allocation12], %s2863_s21  ;;  %s647_s25 = int_to_ptr.hbm [resolvable:$true] %s646_s25 }
  0x35   : > { %s648_s17 = sshll.u32 %s641_s7, 4  ;;  %s535_s28 = scalar_lea.hbm %s3380_s3, %s2693_s15  ;;  %s649_s17 = int_to_ptr.vmem [resolvable:$true] %s648_s17 }
  0x36   : > { %2280 = dma.hbm_to_vmem [thread:$0]  (!%p2872_p10), %s647_s25, 16, %s649_s17, %s3354_s12  }
  0x37   : > { %s539_s20 = sshll.u32 %s532_s14, 4  ;;  %s537_s30 = sshll.u32 %s535_s28, 4  ;;  %s540_s20 = int_to_ptr.vmem [resolvable:$true] %s539_s20  ;;  %s538_s30 = int_to_ptr.hbm [resolvable:$true] %s537_s30 }
  0x38   : > { %s530_s7 = scalar_lea.sflag [#allocation5], %s2863_s21  ;;  %s3381_s6 = sld [smem:[#allocation29_spill]] }
  0x39   : > { %2265 = dma.hbm_to_vmem [thread:$0]  (!%p2872_p10), %s538_s30, 16, %s540_s20, %s530_s7  }
  0x3a   : > { %s574_s17 = scalar_lea.vmem [#allocation8], %s2863_s21  ;;  %s3382_s28 = scalar_lea.sflag [#allocation7], %s2870_s19 }
  0x3b   : > { %s581_s5 = sshll.u32 %s574_s17, 4  ;;  %s3383_s9 = sld [smem:[#allocation32_spill]]  ;;  %s582_s5 = int_to_ptr.vmem [resolvable:$true] %s581_s5 }
  0x3c   : > { %s616_s20 = scalar_lea.vmem [#allocation11], %s2863_s21  ;;  %s3384_s11 = scalar_lea.sflag [#allocation10], %s2870_s19 }
  0x3d   : > { %s623_s30 = sshll.u32 %s616_s20, 4  ;;  %s667_s17 = scalar_lea.hbm %s3343_s13, %s2693_s15  ;;  %s624_s30 = int_to_ptr.vmem [resolvable:$true] %s623_s30 }
  0x3e   : > { %s577_s25 = scalar_lea.hbm %s3381_s6, %s2693_s15  ;;  %s664_s6 = scalar_lea.vmem [#allocation14], %s2863_s21 }
  0x3f   : > { %s579_s16 = sshll.u32 %s577_s25, 4  ;;  %s671_s10 = sshll.u32 %s664_s6, 4  ;;  %s580_s16 = int_to_ptr.hbm [resolvable:$true] %s579_s16  ;;  %s672_s10 = int_to_ptr.vmem [resolvable:$true] %s671_s10 }
  0x40   : > { %2271 = dma.hbm_to_vmem [thread:$0]  (!%p2872_p10), %s580_s16, 16, %s582_s5, %s3382_s28  }
  0x41   : > { %s619_s3 = scalar_lea.hbm %s3383_s9, %s2693_s15  ;;  %s669_s8 = sshll.u32 %s667_s17, 4  ;;  %s670_s8 = int_to_ptr.hbm [resolvable:$true] %s669_s8 }
  0x42   : > { %s621_s7 = sshll.u32 %s619_s3, 4  ;;  %s3385_s12 = scalar_lea.sflag [#allocation13], %s2870_s19  ;;  %s622_s7 = int_to_ptr.hbm [resolvable:$true] %s621_s7 }
  0x43   : > { %2277 = dma.hbm_to_vmem [thread:$0]  (!%p2872_p10), %s622_s7, 16, %s624_s30, %s3384_s11  }
  0x44   : > { %2283 = dma.hbm_to_vmem [thread:$0]  (!%p2872_p10), %s670_s8, 16, %s672_s10, %s3385_s12  }
  0x45   : > { %680 = sbr.rel (%p2892_p13) target bundleno = 2382 (0x94e), region = 84  ;;  %s2950_s3 = sand.u32 (!%p2892_p13), 1, %s2677_s24  }
  0x46   : > { %s683_s5 = scalar_lea.sflag (!%p2892_p13), [#allocation5], %s2950_s3 }
  0x4a   : > { %2656 = dma.done.wait (%p2865_p9), %s683_s5, 16  }
  0x4b   : > { %2658 = vsyncadd (%p2865_p9), %s683_s5, 4294967280  ;;  %s3386_s6 = sadd.s32 4294967295, %s2701_s29  }
  0x4c   : > { %s691_s8 = sand.u32 1, %s3386_s6  }
  0x4d   : > { %s692_s10 = scalar_lea.sflag [#allocation7], %s691_s8 }
  0x4e   : > { %2660 = dma.done.wait (%p2865_p9), %s692_s10, 32  }
  0x4f   : > { %2662 = vsyncadd (%p2865_p9), %s692_s10, 4294967264  ;;  %s710_s23 = scalar_lea.sflag [#allocation10], %s691_s8 }
  0x50   : > { %2664 = dma.done.wait (%p2865_p9), %s710_s23, 32  }
  0x51   : > { %2666 = vsyncadd (%p2865_p9), %s710_s23, 4294967264  ;;  %s728_s14 = scalar_lea.sflag [#allocation13], %s691_s8 }
  0x52   : > { %2668 = dma.done.wait (%p2865_p9), %s728_s14, 32  }
  0x53   : > { %2670 = vsyncadd (%p2865_p9), %s728_s14, 4294967264  ;;  %p840_p0 = scmp.lt.s32.totalorder %s2689_s27, 1  ;;  %p847_p1 = scmp.lt.s32.totalorder %s2685_s26, 1 }
  0x54   : > { %s3387_s12 = sld [smem:[#allocation24_spill]]  ;;  %p2176_p2 = scmp.ne.s32.totalorder %s2685_s26, 0 }
  0x55   : > { %s3420_s27 = smov (!%p840_p0, %s2689_s27), 1  ;;  %s3388_s2 = sld [smem:[#allocation25_spill]] }
  0x56   : > { %s2983_s30 = scalar_select %p847_p1, %s2685_s26, 1 }
  0x57   : > { %s2167_s7 = sshll.u32 %s3420_s27, 3  ;;  %s3389_s4 = sld [smem:[#allocation27_spill]] }
  0x58   : > { %s2234_s6 = sshll.u32 %s2983_s30, 4  ;;  %s3390_s21 = sld [smem:[#allocation31_spill]] }
  0x59   : > { %s2237_s22 = sshll.u32 %s2983_s30, 5  ;;  %s3391_s25 = sld [smem:[#allocation33_spill]] }
  0x5a   : > { %s843_s5 = scalar_lea.vmem %s3387_s12, %s2167_s7  ;;  %s3392_s8 = sld [smem:[#allocation35_spill]] }
  0x5b   : > { %s851_s23 = scalar_lea.vmem %s3388_s2, %s2234_s6  ;;  %s3393_s20 = sld [smem:[#allocation37_spill]] }
  0x5d   : > { %s3000_s28 = scalar_lea.vmem %s3389_s4, %s2234_s6  ;;  %s739_s4 = scalar_lea.vmem [#allocation14], %s2950_s3 }
  0x5e   : > { %s3005_s16 = scalar_lea.vmem %s3390_s21, %s2234_s6  ;;  %877 = sbr.rel (%p2176_p2) target bundleno = 101 (0x65), region = 116 }
  0x5f   : > { %s3011_s7 = scalar_lea.vmem %s3391_s25, %s2237_s22 }
  0x60   : > { %s869_s10 = scalar_lea.vmem %s3392_s8, %s2983_s30 }
  0x61   : > { %s872_s14 = scalar_lea.vmem %s3393_s20, %s3420_s27 }
  0x63   : > { %v878_v1 = vld [vmem:[%s843_s5] sm:$0xff]  ;;  %vm879_vm0 = vcmask 261120  }
  0x64   : > { %880 = vst.msk [vmem:[#allocation2] sm:$0xff] %vm879_vm0, %v878_v1 }
  0x65 PF: > { %v2239_v2 = vld [vmem:[%s851_s23 + $0x8] sm:$0xff]  ;;  %v2238_v3 = vld [vmem:[%s851_s23] sm:$0xff]  ;;  %vm906_vm1 = vcmask 261120   ;;  %s3394_s2 = scalar_lea.vmem [#allocation4], %s2950_s3  ;;  %s2703_s9 = smov 104   ;;  %vm934_vm2 = vcmask 1047556  }
  0x66   : > { %916 = vmatpush.bf16.msra.mxu0 %v2239_v2  ;;  %v2381_v6 = vld [vmem:[%s3394_s2] ss:$0 sm:$0xff]  ;;  %s2704_s21 = smov 120   ;;  %s2705_s19 = smov 112   ;;  %v2707_v16 = vmov 1983009808  }
  0x67   : > { %s2706_s18 = smov 96   ;;  %v939_v17 = vunpack.c.l.s4 %v2707_v16  ;;  %v2708_v30 = vmov 1934713408   ;;  %vm1303_vm3 = vcmask 64512   ;;  %s3395_s6 = scalar_lea.vmem %s3331_s1, %s3420_s27  ;;  %vm1431_vm5 = vcmask 1043456  }
  0x68   : > { %v963_v31 = vunpack.c.l.s4 %v2708_v30  ;;  %s2710_s23 = smov 64   ;;  %s2711_s22 = smov 16   ;;  %vm1628_vm6 = vcmask 130048   ;;  %vm1630_vm7 = vcmask 195584   ;;  %vm1784_vm12 = vcmask 523264  }
  0x69   : > { %v3038_v21 = vunpack.c.0.s8 %v939_v17  ;;  %s2712_s11 = smov 8   ;;  %s2713_s25 = smov 24  }
  0x6a   : > { %917 = vmatpush.bf16.msra.mxu0 %v2238_v3  ;;  %v3048_v36 = vunpack.c.0.s8 %v963_v31  ;;  %s3396_s17 = scalar_lea.vmem [#allocation6], %s2950_s3  ;;  %s3399_s12 = scalar_lea.vmem [#allocation11], %s2950_s3 }
  0x6b   : > { %v3023_v4 = vld [vmem:[#allocation2] sm:$0xff]  ;;  %s3400_s8 = scalar_lea.vmem [#allocation12], %s2950_s3  ;;  %p2229_p3 = scmp.ne.s32.totalorder %s2685_s26, 1 }
  0x6c   : > { %v885_v5 = vpack.c.bf16 %v3023_v4, %v3023_v4 }
  0x6e   : > { %2185 = vmatmul.msk.bf16.vlgmr.msra.gmra.mxu0 %vm906_vm1, %v885_v5 }
  0xeb   : > { %v919_v7 = vpop.f32.mrf.mxu0 }
  0xec   : > { %v920_v8 = vadd.f32 %v2381_v6, %v919_v7 }
  0xee   : > { %930 = vrot.lane.b32.xlu1 %v920_v8, %s2703_s9  ;;  %924 = vrot.lane.b32.xlu0 %v920_v8, %s2704_s21  ;;  %v936_v18 = vrot.slane %v920_v8, 4 }
  0xf3   : > { %v921_v9 = vpop.f32.mrf.mxu0 }
  0xf6   : > { %927 = vrot.lane.b32.xlu0 %v920_v8, %s2705_s19  ;;  %s3402_s19 = sld [smem:[#allocation36_spill]] (!%p2229_p3) }
 0x160   : > { %v925_v10 = vpop.permute.xlu0 %924  ;;  %v931_v12 = vpop.permute.xlu1 %930 }
 0x161   : > { %v3030_v11 = vpack.i.bf16 %v925_v10, %v920_v8  ;;  %v946_v22 = vrot.slane %v931_v12, 4  ;;  %v948_v23 = vrot.slane %v925_v10, 4 }
 0x163   : > { %2362 = vrot.lane.b32.xlu1 %v3030_v11, %s2706_s18  ;;  %v947_v26 = vsel %vm934_vm2, %v946_v22, %v925_v10  ;;  %v949_v27 = vsel %vm934_vm2, %v931_v12, %v948_v23 }
 0x164   : > { %v953_v32 = vperm.slane %v947_v26, %v3038_v21  ;;  %v957_v33 = vperm.slane %v949_v27, %v3038_v21 }
 0x166   : > { %v958_v37 = vrot.slane %v953_v32, 4  ;;  %v970_v38 = vrot.slane %v957_v33, 4 }
 0x168   : > { %v928_v13 = vpop.permute.xlu0 %927 }
 0x169   : > { %v3033_v14 = vpack.i.bf16 %v931_v12, %v928_v13  ;;  %v933_v15 = vrot.slane %v928_v13, 4  ;;  %v937_v20 = vsel %vm934_vm2, %v928_v13, %v936_v18 }
 0x16a   : > { %v945_v25 = vperm.slane %v937_v20, %v3038_v21 }
 0x16b   : > { %2367 = vrot.lane.b32.xlu2 %v3033_v14, %s2706_s18  ;;  %v935_v19 = vsel %vm934_vm2, %v933_v15, %v920_v8 }
 0x16c   : > { %v941_v24 = vperm.slane %v935_v19, %v3038_v21  ;;  %v972_v29 = vrot.slane %v945_v25, 4  ;;  %v971_v43 = vsel %vm934_vm2, %v970_v38, %v945_v25 }
 0x16d   : > { %v977_v47 = vperm.slane %v971_v43, %v3048_v36 }
 0x16e   : > { %v960_v28 = vrot.slane %v941_v24, 4  ;;  %v973_v35 = vsel %vm934_vm2, %v957_v33, %v972_v29  ;;  %v959_v42 = vsel %vm934_vm2, %v958_v37, %v941_v24 }
 0x16f   : > { %v981_v40 = vperm.slane %v973_v35, %v3048_v36  ;;  %v965_v46 = vperm.slane %v959_v42, %v3048_v36  ;;  %v986_v57 = vrot.slane %v977_v47, 4 }
 0x170   : > { %v961_v34 = vsel %vm934_vm2, %v953_v32, %v960_v28 }
 0x171   : > { %v969_v39 = vperm.slane %v961_v34, %v3048_v36  ;;  %v988_v49 = vrot.slane %v981_v40, 4  ;;  %v982_v55 = vrot.slane %v965_v46, 4  ;;  %v987_v13 = vsel %vm934_vm2, 0.0, %v986_v57 }
 0x173   : > { %v984_v48 = vrot.slane %v969_v39, 4  ;;  %v989_v58 = vsel %vm934_vm2, 0.0, %v988_v49  ;;  %v1001_v63 = vsel %vm934_vm2, %v988_v49, %v977_v47  ;;  %v983_v12 = vsel %vm934_vm2, 0.0, %v982_v55 }
 0x174   : > { %v1006_v3 = vrot.slane %v989_v58, 4  ;;  %v1005_v20 = vperm.slane %v1001_v63, %v3038_v21 }
 0x175   : > { %v985_v56 = vsel %vm934_vm2, 0.0, %v984_v48  ;;  %v990_v15 = vsel %vm934_vm2, %v984_v48, %v965_v46 }
 0x176   : > { %v995_v2 = vrot.slane %v985_v56, 4  ;;  %v1007_v25 = vsel %vm934_vm2, %v1006_v3, %v987_v13  ;;  %v994_v28 = vperm.slane %v990_v15, %v3038_v21  ;;  %v1026_v42 = vrot.slane %v1005_v20, 4 }
 0x177   : > { %v1011_v38 = vperm.slane %v1007_v25, %v3038_v21 }
 0x178   : > { %v996_v24 = vsel %vm934_vm2, %v995_v2, %v983_v12 }
 0x179   : > { %v1000_v33 = vperm.slane %v996_v24, %v3038_v21 }
 0x1c5   : > { %v2368_v41 = vpop.permute.xlu2 %2367 }
 0x1c6   : > { %v2370_v44 = vunpack.i.h.bf16 %v2368_v41  ;;  %v2369_v45 = vunpack.i.l.bf16 %v2368_v41  ;;  %v1014_v41 = vrot.slane %v994_v28, 4 }
 0x1c8   : > { %v1072_v51 = vrot.slane %v2370_v44, 4  ;;  %v1060_v52 = vrot.slane %v2369_v45, 4 }
 0x1d5   : > { %v2363_v50 = vpop.permute.xlu1 %2362 }
 0x1d6   : > { %v2365_v53 = vunpack.i.h.bf16 %v2363_v50  ;;  %v2364_v54 = vunpack.i.l.bf16 %v2363_v50  ;;  %v1012_v50 = vrot.slane %v1000_v33, 4 }
 0x1d8   : > { %v1074_v59 = vrot.slane %v2365_v53, 4  ;;  %v1061_v60 = vsel %vm934_vm2, %v1060_v52, %v2364_v54  ;;  %v1062_v61 = vrot.slane %v2364_v54, 4  ;;  %v1073_v62 = vsel %vm934_vm2, %v1072_v51, %v2365_v53 }
 0x1d9   : > { %v1067_v0 = vperm.slane %v1061_v60, %v3038_v21  ;;  %v1079_v1 = vperm.slane %v1073_v62, %v3038_v21  ;;  %v1024_v54 = vrot.slane %v1011_v38, 4  ;;  %v1015_v60 = vsel %vm934_vm2, %v1000_v33, %v1014_v41 }
 0x1da   : > { %v1063_v5 = vsel %vm934_vm2, %v2369_v45, %v1062_v61  ;;  %v1075_v6 = vsel %vm934_vm2, %v2370_v44, %v1074_v59  ;;  %v1027_v62 = vsel %vm934_vm2, %v1011_v38, %v1026_v42  ;;  %v1013_v63 = vsel %vm934_vm2, %v1012_v50, %v994_v28 }
 0x1db   : > { %v1071_v7 = vperm.slane %v1063_v5, %v3038_v21  ;;  %v1083_v8 = vperm.slane %v1075_v6, %v3038_v21  ;;  %v1084_v9 = vrot.slane %v1079_v1, 4  ;;  %v1086_v10 = vrot.slane %v1067_v0, 4 }
 0x1dc   : > { %v1025_v3 = vsel %vm934_vm2, %v1024_v54, %v1005_v20  ;;  %v1019_v12 = vperm.slane %v1013_v63, %v3048_v36 }
 0x1dd   : > { %v1085_v16 = vsel %vm934_vm2, %v1084_v9, %v1067_v0  ;;  %v1087_v17 = vsel %vm934_vm2, %v1079_v1, %v1086_v10  ;;  %v1096_v18 = vrot.slane %v1083_v8, 4  ;;  %v1098_v19 = vrot.slane %v1071_v7, 4 }
 0x1de   : > { %v1091_v22 = vperm.slane %v1085_v16, %v3048_v36  ;;  %v1095_v23 = vperm.slane %v1087_v17, %v3048_v36  ;;  %v1035_v10 = vperm.slane %v1027_v62, %v3048_v36 }
 0x1df   : > { %v1097_v26 = vsel %vm934_vm2, %v1096_v18, %v1071_v7  ;;  %v1099_v27 = vsel %vm934_vm2, %v1083_v8, %v1098_v19  ;;  %v1023_v8 = vperm.slane %v1015_v60, %v3048_v36  ;;  %v1031_v19 = vperm.slane %v1025_v3, %v3048_v36 }
 0x1e0   : > { %v1103_v29 = vperm.slane %v1097_v26, %v3048_v36  ;;  %v1107_v30 = vperm.slane %v1099_v27, %v3048_v36  ;;  %v1108_v31 = vrot.slane %v1091_v22, 4  ;;  %v1110_v32 = vrot.slane %v1095_v23, 4 }
 0x1e1   : > { %v1042_v24 = vrot.slane %v1023_v8, 4 }
 0x1e2   : > { %v1111_v34 = vsel %vm934_vm2, 0.0, %v1110_v32  ;;  %v1112_v35 = vrot.slane %v1103_v29, 4  ;;  %v1114_v37 = vrot.slane %v1107_v30, 4  ;;  %v1116_v39 = vsel %vm934_vm2, %v1110_v32, %v1091_v22 }
 0x1e3   : > { %v1121_v40 = vrot.slane %v1111_v34, 4  ;;  %v1109_v43 = vsel %vm934_vm2, 0.0, %v1108_v31  ;;  %v1120_v45 = vperm.slane %v1116_v39, %v3038_v21  ;;  %v1040_v30 = vrot.slane %v1035_v10, 4 }
 0x1e4   : > { %v1115_v44 = vsel %vm934_vm2, 0.0, %v1114_v37  ;;  %v1127_v46 = vsel %vm934_vm2, %v1114_v37, %v1103_v29  ;;  %v1113_v51 = vsel %vm934_vm2, 0.0, %v1112_v35  ;;  %v1038_v29 = vrot.slane %v1019_v12, 4 }
 0x1e5   : > { %v1132_v47 = vrot.slane %v1115_v44, 4  ;;  %v1122_v48 = vsel %vm934_vm2, %v1121_v40, %v1109_v43  ;;  %v1131_v49 = vperm.slane %v1127_v46, %v3038_v21  ;;  %v1140_v53 = vrot.slane %v1120_v45, 4 }
 0x1e6   : > { %v1126_v52 = vperm.slane %v1122_v48, %v3038_v21  ;;  %v1043_v34 = vsel %vm934_vm2, %v1035_v10, %v1042_v24  ;;  %v1036_v35 = vrot.slane %v1031_v19, 4  ;;  %v1039_v38 = vsel %vm934_vm2, %v1031_v19, %v1038_v29 }
 0x1e7   : > { %v1133_v55 = vsel %vm934_vm2, %v1132_v47, %v1113_v51  ;;  %v1152_v56 = vrot.slane %v1131_v49, 4  ;;  %v1041_v39 = vsel %vm934_vm2, %v1040_v30, %v1023_v8  ;;  %v1047_v40 = vpack.c.bf16 %v1043_v34, %v1043_v34 }
 0x1e8   : > { %v1137_v57 = vperm.slane %v1133_v55, %v3038_v21  ;;  %v1141_v58 = vsel %vm934_vm2, %v1126_v52, %v1140_v53  ;;  %v1138_v59 = vrot.slane %v1126_v52, 4  ;;  %v1037_v41 = vsel %vm934_vm2, %v1036_v35, %v1019_v12 }
 0x1e9   : > { %v1149_v61 = vperm.slane %v1141_v58, %v3048_v36  ;;  %v1045_v42 = vpack.c.bf16 %v1039_v38, %v1039_v38  ;;  %v1046_v43 = vpack.c.bf16 %v1041_v39, %v1041_v39  ;;  %v1044_v44 = vpack.c.bf16 %v1037_v41, %v1037_v41 }
 0x1ea   : > { %v1153_v0 = vsel %vm934_vm2, %v1137_v57, %v1152_v56  ;;  %v1139_v1 = vsel %vm934_vm2, %v1138_v59, %v1120_v45  ;;  %v1150_v2 = vrot.slane %v1137_v57, 4  ;;  %v3133_v45 = vld [vmem:[%s3395_s6] sm:$0x1]  ;;  %v2709_v46 = vmov -1e+09  }
 0x1eb   : > { %v1161_v5 = vperm.slane %v1153_v0, %v3048_v36  ;;  %v1168_v6 = vrot.slane %v1149_v61, 4  ;;  %v1145_v7 = vperm.slane %v1139_v1, %v3048_v36  ;;  %vm882_vm4 = vcmp.gt.f32.partialorder %v3133_v45, 0.5 }
 0x1ec   : > { %v1151_v9 = vsel %vm934_vm2, %v1150_v2, %v1131_v49  ;;  %v883_v47 = vsel %vm882_vm4, 0.0, %v2709_v46 }
 0x1ed   : > { %v1169_v13 = vsel %vm934_vm2, %v1161_v5, %v1168_v6  ;;  %v1157_v15 = vperm.slane %v1151_v9, %v3048_v36  ;;  %v1164_v16 = vrot.slane %v1145_v7, 4  ;;  %v1166_v17 = vrot.slane %v1161_v5, 4 }
 0x1ee   : > { %v1173_v18 = vpack.c.bf16 %v1169_v13, %v1169_v13  ;;  %v1301_v48 = vperm.slane %v883_v47, 0 }
 0x1ef   : > { %v1165_v20 = vsel %vm934_vm2, %v1157_v15, %v1164_v16  ;;  %v1167_v22 = vsel %vm934_vm2, %v1166_v17, %v1149_v61  ;;  %v1162_v23 = vrot.slane %v1157_v15, 4 }
 0x1f0   : > { %v1365_v25 = vsel %vm1303_vm3, %v1173_v18, 0  ;;  %v1171_v26 = vpack.c.bf16 %v1165_v20, %v1165_v20  ;;  %v1172_v27 = vpack.c.bf16 %v1167_v22, %v1167_v22 }
 0x1f1   : > { %1374 = vmatpush.bf16.xpose.msrb.mxu0 %v1365_v25  ;;  %v1163_v28 = vsel %vm934_vm2, %v1162_v23, %v1145_v7 }
 0x1f2   : > { %v1327_v31 = vsel %vm1303_vm3, %v1171_v26, 0  ;;  %v1346_v32 = vsel %vm1303_vm3, %v1172_v27, 0  ;;  %v1170_v33 = vpack.c.bf16 %v1163_v28, %v1163_v28 }
 0x1f3   : > { %1336 = vmatpush.bf16.xpose.msra.mxu2 %v1327_v31  ;;  %1355 = vmatpush.bf16.xpose.msra.mxu3 %v1346_v32 }
 0x1f4   : > { %v1308_v37 = vsel %vm1303_vm3, %v1170_v33, 0 }
 0x1f5   : > { %1317 = vmatpush.bf16.xpose.msra.mxu1 %v1308_v37 }
 0x1f8   : > { %2189 = vmatmul.msk.bf16.vlgmr.msrb.gmra.mxu0 %vm1303_vm3, %v1047_v40 }
 0x1fa   : > { %2187 = vmatmul.msk.bf16.vlgmr.msra.gmra.mxu2 %vm1303_vm3, %v1045_v42  ;;  %2188 = vmatmul.msk.bf16.vlgmr.msra.gmra.mxu3 %vm1303_vm3, %v1046_v43 }
 0x1fc   : > { %2186 = vmatmul.msk.bf16.vlgmr.msra.gmra.mxu1 %vm1303_vm3, %v1044_v44 }
 0x275   : > { %v1376_v49 = vpop.f32.mrf.mxu0 }
 0x276   : > { %v1377_v50 = vadd.f32 %v1376_v49, %v1301_v48 }
 0x278   : > { %v1389_v51 = vsel %vm1303_vm3, %v1377_v50, -inf }
 0x279   : > { %v1319_v52 = vpop.f32.mrf.mxu1  ;;  %1390 = vmax.xlane.f32.xlu2 %v1389_v51 }
 0x27a   : > { %v1320_v53 = vadd.f32 %v1319_v52, %v1301_v48 }
 0x27c   : > { %v1380_v54 = vsel %vm1303_vm3, %v1320_v53, -inf }
 0x27d   : > { %v1338_v55 = vpop.f32.mrf.mxu2  ;;  %v1357_v56 = vpop.f32.mrf.mxu3  ;;  %1381 = vmax.xlane.f32.xlu1 %v1380_v54 }
 0x27e   : > { %v1339_v57 = vadd.f32 %v1338_v55, %v1301_v48  ;;  %v1358_v58 = vadd.f32 %v1357_v56, %v1301_v48  ;;  %v1378_v59 = vpop.f32.mrf.mxu0 }
 0x280   : > { %v1386_v60 = vsel %vm1303_vm3, %v1358_v58, -inf  ;;  %v1383_v61 = vsel %vm1303_vm3, %v1339_v57, -inf }
 0x281   : > { %v1321_v62 = vpop.f32.mrf.mxu1  ;;  %1387 = vmax.xlane.f32.xlu2 %v1386_v60  ;;  %1384 = vmax.xlane.f32.xlu0 %v1383_v61 }
 0x285   : > { %v1340_v63 = vpop.f32.mrf.mxu2  ;;  %v1359_v0 = vpop.f32.mrf.mxu3 }
 0x295   : > { %2377 = vrot.lane.b32.xlu0 %v3033_v14, %s2710_s23 }
 0x299   : > { %2372 = vrot.lane.b32.xlu2 %v3030_v11, %s2710_s23 }
 0x2ec   : > { %v1391_v1 = vpop.xlane.xlu2 %1390 }
 0x2ed   : > { %v1395_v2 = vsub.f32 %v1377_v50, %v1391_v1 }
 0x2ef   : > { %v1402_v3 = vmul.f32 1.442695, %v1395_v2 }
 0x2f0   : > { %v1382_v14 = vpop.xlane.xlu1 %1381 }
 0x2f1   : > { %2389 = vpow2.f32 %v1402_v3  ;;  %v1392_v11 = vsub.f32 %v1320_v53, %v1382_v14 }
 0x2f3   : > { %v1396_v18 = vmul.f32 1.442695, %v1392_v11 }
 0x2f4   : > { %v1388_v5 = vpop.xlane.xlu2 %1387  ;;  %v1385_v6 = vpop.xlane.xlu0 %1384 }
 0x2f5   : > { %v1394_v7 = vsub.f32 %v1358_v58, %v1388_v5  ;;  %v1393_v10 = vsub.f32 %v1339_v57, %v1385_v6 }
 0x2f7   : > { %v3142_v8 = vpop.eup %2389  ;;  %v1400_v9 = vmul.f32 1.442695, %v1394_v7  ;;  %v1398_v13 = vmul.f32 1.442695, %v1393_v10 }
 0x2f8   : > { %v1413_v12 = vsel %vm1303_vm3, %v3142_v8, 0.0 }
 0x2f9   : > { %2391 = vpow2.f32 %v1400_v9  ;;  %1414 = vadd.xlane.f32.xlu0 %v1413_v12 }
 0x2fa   : > { %2393 = vpow2.f32 %v1398_v13 }
 0x2fb   : > { %2395 = vpow2.f32 %v1396_v18 }
 0x2fc   : > { %v2373_v16 = vpop.permute.xlu2 %2372 }
 0x2fd   : > { %v2375_v19 = vunpack.i.h.bf16 %v2373_v16  ;;  %v2374_v20 = vunpack.i.l.bf16 %v2373_v16 }
 0x2ff   : > { %v3146_v15 = vpop.eup %2391  ;;  %v1200_v23 = vrot.slane %v2375_v19, 4  ;;  %v1188_v25 = vrot.slane %v2374_v20, 4 }
 0x300   : > { %v1410_v17 = vsel %vm1303_vm3, %v3146_v15, 0.0  ;;  %v3150_v22 = vpop.eup %2393 }
 0x301   : > { %1411 = vadd.xlane.f32.xlu1 %v1410_v17  ;;  %v1407_v28 = vsel %vm1303_vm3, %v3150_v22, 0.0  ;;  %v3160_v38 = vpop.eup %2395 }
 0x302   : > { %v1404_v50 = vsel %vm1303_vm3, %v3160_v38, 0.0 }
 0x307   : > { %v2378_v24 = vpop.permute.xlu0 %2377 }
 0x308   : > { %v2380_v26 = vunpack.i.h.bf16 %v2378_v24  ;;  %v2379_v27 = vunpack.i.l.bf16 %v2378_v24 }
 0x309   : > { %1408 = vadd.xlane.f32.xlu1 %v1407_v28 }
 0x30a   : > { %v1198_v29 = vrot.slane %v2380_v26, 4  ;;  %v1201_v30 = vsel %vm934_vm2, %v2380_v26, %v1200_v23  ;;  %v1186_v31 = vrot.slane %v2379_v27, 4  ;;  %v1189_v32 = vsel %vm934_vm2, %v2379_v27, %v1188_v25 }
 0x30b   : > { %v1209_v33 = vperm.slane %v1201_v30, %v3038_v21  ;;  %v1197_v34 = vperm.slane %v1189_v32, %v3038_v21 }
 0x30c   : > { %v1199_v35 = vsel %vm934_vm2, %v1198_v29, %v2375_v19  ;;  %v1187_v37 = vsel %vm934_vm2, %v1186_v31, %v2374_v20 }
 0x30d   : > { %v1205_v39 = vperm.slane %v1199_v35, %v3038_v21  ;;  %v1222_v40 = vrot.slane %v1209_v33, 4  ;;  %v1193_v41 = vperm.slane %v1187_v37, %v3038_v21  ;;  %v1224_v42 = vrot.slane %v1197_v34, 4 }
 0x30f   : > { %v1210_v43 = vrot.slane %v1205_v39, 4  ;;  %v1212_v44 = vrot.slane %v1193_v41, 4  ;;  %v1223_v46 = vsel %vm934_vm2, %v1222_v40, %v1197_v34  ;;  %v1225_v47 = vsel %vm934_vm2, %v1209_v33, %v1224_v42 }
 0x310   : > { %v1229_v48 = vperm.slane %v1223_v46, %v3048_v36  ;;  %v1233_v49 = vperm.slane %v1225_v47, %v3048_v36 }
 0x311   : > { %v1211_v51 = vsel %vm934_vm2, %v1210_v43, %v1193_v41  ;;  %v1213_v52 = vsel %vm934_vm2, %v1205_v39, %v1212_v44  ;;  %1405 = vadd.xlane.f32.xlu1 %v1404_v50 }
 0x312   : > { %v1217_v53 = vperm.slane %v1211_v51, %v3048_v36  ;;  %v1221_v54 = vperm.slane %v1213_v52, %v3048_v36  ;;  %v1238_v55 = vrot.slane %v1229_v48, 4  ;;  %v1240_v56 = vrot.slane %v1233_v49, 4 }
 0x314   : > { %v1234_v57 = vrot.slane %v1217_v53, 4  ;;  %v1236_v58 = vrot.slane %v1221_v54, 4  ;;  %v1241_v59 = vsel %vm934_vm2, 0.0, %v1240_v56  ;;  %v1253_v60 = vsel %vm934_vm2, %v1240_v56, %v1229_v48 }
 0x315   : > { %v1258_v61 = vrot.slane %v1241_v59, 4  ;;  %v1239_v63 = vsel %vm934_vm2, 0.0, %v1238_v55  ;;  %v1257_v1 = vperm.slane %v1253_v60, %v3038_v21 }
 0x316   : > { %v1237_v62 = vsel %vm934_vm2, 0.0, %v1236_v58  ;;  %v1242_v0 = vsel %vm934_vm2, %v1236_v58, %v1217_v53  ;;  %v1235_v6 = vsel %vm934_vm2, 0.0, %v1234_v57 }
 0x317   : > { %v1247_v2 = vrot.slane %v1237_v62, 4  ;;  %v1246_v3 = vperm.slane %v1242_v0, %v3038_v21  ;;  %v1259_v5 = vsel %vm934_vm2, %v1258_v61, %v1239_v63  ;;  %v1278_v9 = vrot.slane %v1257_v1, 4 }
 0x318   : > { %v1263_v7 = vperm.slane %v1259_v5, %v3038_v21 }
 0x319   : > { %v1248_v10 = vsel %vm934_vm2, %v1247_v2, %v1235_v6  ;;  %v1266_v12 = vrot.slane %v1246_v3, 4 }
 0x31a   : > { %v1252_v13 = vperm.slane %v1248_v10, %v3038_v21  ;;  %v1279_v14 = vsel %vm934_vm2, %v1263_v7, %v1278_v9  ;;  %v1276_v11 = vrot.slane %v1263_v7, 4 }
 0x31b   : > { %v1287_v16 = vperm.slane %v1279_v14, %v3048_v36 }
 0x31c   : > { %v1267_v17 = vsel %vm934_vm2, %v1252_v13, %v1266_v12  ;;  %v1264_v18 = vrot.slane %v1252_v13, 4  ;;  %v1277_v19 = vsel %vm934_vm2, %v1276_v11, %v1257_v1 }
 0x31d   : > { %v1275_v20 = vperm.slane %v1267_v17, %v3048_v36  ;;  %v1292_v23 = vrot.slane %v1287_v16, 4  ;;  %v1283_v24 = vperm.slane %v1277_v19, %v3048_v36 }
 0x31e   : > { %v1265_v25 = vsel %vm934_vm2, %v1264_v18, %v1246_v3 }
 0x31f   : > { %v1293_v26 = vsel %vm934_vm2, %v1292_v23, %v1275_v20  ;;  %v1294_v27 = vrot.slane %v1275_v20, 4  ;;  %v1271_v28 = vperm.slane %v1265_v25, %v3048_v36  ;;  %v1288_v29 = vrot.slane %v1283_v24, 4 }
 0x320   : > { %v1298_v30 = vpack.c.bf16 %v1293_v26, %v1293_v26 }
 0x321   : > { %v1289_v31 = vsel %vm934_vm2, %v1288_v29, %v1271_v28  ;;  %v1295_v32 = vsel %vm934_vm2, %v1287_v16, %v1294_v27  ;;  %v1290_v33 = vrot.slane %v1271_v28, 4 }
 0x322   : > { %v1471_v34 = vsel %vm1431_vm5, %v1298_v30, 0  ;;  %v1296_v35 = vpack.c.bf16 %v1289_v31, %v1289_v31  ;;  %v1299_v37 = vpack.c.bf16 %v1295_v32, %v1295_v32 }
 0x323   : > { %1480 = vmatpush.bf16.msrb.mxu3 %v1471_v34  ;;  %v1291_v39 = vsel %vm934_vm2, %v1283_v24, %v1290_v33 }
 0x324   : > { %v1433_v40 = vsel %vm1431_vm5, %v1296_v35, 0  ;;  %v1490_v41 = vsel %vm1431_vm5, %v1299_v37, 0  ;;  %v1297_v42 = vpack.c.bf16 %v1291_v39, %v1291_v39 }
 0x325   : > { %1442 = vmatpush.bf16.msrb.mxu1 %v1433_v40  ;;  %1499 = vmatpush.bf16.msra.mxu0 %v1490_v41 }
 0x326   : > { %v1452_v43 = vsel %vm1431_vm5, %v1297_v42, 0 }
 0x327   : > { %1461 = vmatpush.bf16.msrb.mxu2 %v1452_v43 }
 0x36c   : > { %v1415_v44 = vpop.xlane.xlu0 %1414 }
 0x36d   : > { %2397 = vrcp.f32 %v1415_v44 }
 0x373   : > { %v2398_v46 = vpop.eup %2397 }
 0x374   : > { %v1423_v47 = vmul.f32 %v2398_v46, %v3142_v8  ;;  %v1412_v48 = vpop.xlane.xlu1 %1411 }
 0x375   : > { %2399 = vrcp.f32 %v1412_v48 }
 0x376   : > { %v1427_v49 = vpack.c.bf16 %v1423_v47, %v1423_v47 }
 0x378   : > { %2193 = vmatmul.msk.bf16.vlgmr.msra.gmra.mxu0 %vm1303_vm3, %v1427_v49 }
 0x37b   : > { %v2400_v50 = vpop.eup %2399 }
 0x37c   : > { %v1422_v51 = vmul.f32 %v2400_v50, %v3146_v15  ;;  %v1409_v52 = vpop.xlane.xlu1 %1408 }
 0x37d   : > { %2401 = vrcp.f32 %v1409_v52 }
 0x37e   : > { %v1426_v53 = vpack.c.bf16 %v1422_v51, %v1422_v51 }
 0x380   : > { %2192 = vmatmul.msk.bf16.vlgmr.msrb.gmra.mxu3 %vm1303_vm3, %v1426_v53 }
 0x383   : > { %v2402_v54 = vpop.eup %2401 }
 0x384   : > { %v1421_v55 = vmul.f32 %v2402_v54, %v3150_v22  ;;  %v1406_v56 = vpop.xlane.xlu1 %1405 }
 0x385   : > { %2403 = vrcp.f32 %v1406_v56 }
 0x386   : > { %v1425_v57 = vpack.c.bf16 %v1421_v55, %v1421_v55 }
 0x388   : > { %2191 = vmatmul.msk.bf16.vlgmr.msrb.gmra.mxu2 %vm1303_vm3, %v1425_v57 }
 0x38b   : > { %v2404_v8 = vpop.eup %2403 }
 0x38c   : > { %v1420_v58 = vmul.f32 %v2404_v8, %v3160_v38 }
 0x38e   : > { %v1424_v59 = vpack.c.bf16 %v1420_v58, %v1420_v58 }
 0x390   : > { %2190 = vmatmul.msk.bf16.vlgmr.msrb.gmra.mxu1 %vm1303_vm3, %v1424_v59 }
 0x3f5   : > { %v1501_v15 = vpop.f32.mrf.mxu0 }
 0x3f6   : > { %v1517_v62 = vrot.slane %v1501_v15, 4 }
 0x3fd   : > { %v1503_v60 = vpop.f32.mrf.mxu0 }
 0x403   : > { %v1482_v61 = vpop.f32.mrf.mxu3 }
 0x404   : > { %v1505_v1 = vrot.slane %v1482_v61, 4 }
 0x40b   : > { %v1463_v63 = vpop.f32.mrf.mxu2  ;;  %v1484_v0 = vpop.f32.mrf.mxu3 }
 0x40c   : > { %v1518_v22 = vsel %vm934_vm2, %v1517_v62, %v1463_v63  ;;  %v1519_v2 = vrot.slane %v1463_v63, 4 }
 0x40d   : > { %v1524_v3 = vperm.slane %v1518_v22, %v3038_v21  ;;  %v1444_v5 = vpop.f32.mrf.mxu1 }
 0x40e   : > { %v1520_v6 = vsel %vm934_vm2, %v1501_v15, %v1519_v2  ;;  %v1506_v38 = vsel %vm934_vm2, %v1505_v1, %v1444_v5  ;;  %v1507_v7 = vrot.slane %v1444_v5, 4 }
 0x40f   : > { %v1528_v9 = vperm.slane %v1520_v6, %v3038_v21  ;;  %v1529_v10 = vrot.slane %v1524_v3, 4  ;;  %v1512_v12 = vperm.slane %v1506_v38, %v3038_v21 }
 0x410   : > { %v1508_v13 = vsel %vm934_vm2, %v1482_v61, %v1507_v7 }
 0x411   : > { %v1541_v14 = vrot.slane %v1528_v9, 4  ;;  %v1516_v11 = vperm.slane %v1508_v13, %v3038_v21  ;;  %v1530_v16 = vsel %vm934_vm2, %v1529_v10, %v1512_v12  ;;  %v1531_v17 = vrot.slane %v1512_v12, 4  ;;  %v2382_v13 = vld [vmem:[%s3396_s17] ss:$0 sm:$0xff] }
 0x412   : > { %v1536_v18 = vperm.slane %v1530_v16, %v3048_v36 }
 0x413   : > { %v1532_v19 = vsel %vm934_vm2, %v1524_v3, %v1531_v17  ;;  %v1542_v20 = vsel %vm934_vm2, %v1541_v14, %v1516_v11  ;;  %v1543_v23 = vrot.slane %v1516_v11, 4  ;;  %v1465_v24 = vpop.f32.mrf.mxu2  ;;  %v2240_v3 = vld [vmem:[%s3000_s28] sm:$0xff] }
 0x414   : > { %v1540_v25 = vperm.slane %v1532_v19, %v3048_v36  ;;  %v1548_v26 = vperm.slane %v1542_v20, %v3048_v36  ;;  %v1553_v30 = vrot.slane %v1536_v18, 4  ;;  %v2714_v19 = vmov 32.0  }
 0x415   : > { %v1544_v27 = vsel %vm934_vm2, %v1528_v9, %v1543_v23  ;;  %v1446_v28 = vpop.f32.mrf.mxu1  ;;  %2405 = vrcp.f32 %v2714_v19 }
 0x416   : > { %v1552_v29 = vperm.slane %v1544_v27, %v3048_v36  ;;  %v1555_v31 = vrot.slane %v1540_v25, 4  ;;  %v1557_v33 = vrot.slane %v1548_v26, 4  ;;  %v1554_v40 = vsel %vm934_vm2, 0.0, %v1553_v30 }
 0x418   : > { %v1556_v32 = vsel %vm934_vm2, 0.0, %v1555_v31  ;;  %v1559_v34 = vrot.slane %v1552_v29, 4  ;;  %v1561_v35 = vsel %vm934_vm2, %v1555_v31, %v1536_v18  ;;  %v1558_v47 = vsel %vm934_vm2, 0.0, %v1557_v33  ;;  %v2242_v33 = vld [vmem:[%s3005_s16] sm:$0xff] }
 0x419   : > { %v1566_v37 = vrot.slane %v1556_v32, 4  ;;  %v1565_v39 = vperm.slane %v1561_v35, %v3038_v21  ;;  %v2243_v32 = vld [vmem:[%s3005_s16 + $0x8] sm:$0xff]  ;;  %s3397_s16 = scalar_lea.vmem [#allocation8], %s2950_s3 }
 0x41a   : > { %v1560_v41 = vsel %vm934_vm2, 0.0, %v1559_v34  ;;  %v1572_v42 = vsel %vm934_vm2, %v1559_v34, %v1548_v26  ;;  %1739 = vmatpush.bf16.msra.mxu2 %v2243_v32  ;;  %v2247_v34 = vld [vmem:[%s3011_s7 + $0x18] sm:$0xff] }
 0x41b   : > { %v1577_v43 = vrot.slane %v1560_v41, 4  ;;  %v1567_v44 = vsel %vm934_vm2, %v1566_v37, %v1554_v40  ;;  %v1576_v46 = vperm.slane %v1572_v42, %v3038_v21  ;;  %v1585_v49 = vrot.slane %v1565_v39, 4  ;;  %v2406_v20 = vpop.eup %2405  ;;  %1792 = vmatpush.bf16.msra.mxu3 %v2247_v34 }
 0x41c   : > { %v1571_v48 = vperm.slane %v1567_v44, %v3038_v21  ;;  %v1676_v23 = vmul.f32 32.0, %v2406_v20  ;;  %vm1680_vm8 = vweird.f32 %v2406_v20 }
 0x41d   : > { %v1578_v50 = vsel %vm934_vm2, %v1577_v43, %v1558_v47  ;;  %v1597_v51 = vrot.slane %v1576_v46, 4 }
 0x41e   : > { %v1582_v52 = vperm.slane %v1578_v50, %v3038_v21  ;;  %v1583_v53 = vrot.slane %v1571_v48, 4  ;;  %v1586_v54 = vsel %vm934_vm2, %v1571_v48, %v1585_v49  ;;  %v1677_v24 = vsub.f32 1.0, %v1676_v23  ;;  %1740 = vmatpush.bf16.msra.mxu2 %v2242_v33  ;;  %v2383_v48 = vld [vmem:[%s3397_s16] ss:$0 sm:$0xff] }
 0x41f   : > { %v1594_v15 = vperm.slane %v1586_v54, %v3048_v36 }
 0x420   : > { %v1598_v55 = vsel %vm934_vm2, %v1582_v52, %v1597_v51  ;;  %v1584_v56 = vsel %vm934_vm2, %v1583_v53, %v1565_v39  ;;  %v1595_v57 = vrot.slane %v1582_v52, 4  ;;  %v1678_v25 = vmul.f32 %v2406_v20, %v1677_v24  ;;  %v2246_v39 = vld [vmem:[%s3011_s7 + $0x10] sm:$0xff] }
 0x421   : > { %v1606_v8 = vperm.slane %v1598_v55, %v3048_v36  ;;  %v1590_v58 = vperm.slane %v1584_v56, %v3048_v36  ;;  %v1613_v22 = vrot.slane %v1594_v15, 4  ;;  %1793 = vmatpush.bf16.msra.mxu3 %v2246_v39  ;;  %v2245_v55 = vld [vmem:[%s3011_s7 + $0x8] sm:$0xff]  ;;  %v2244_v56 = vld [vmem:[%s3011_s7] sm:$0xff] }
 0x422   : > { %v1596_v59 = vsel %vm934_vm2, %v1595_v57, %v1576_v46  ;;  %v1679_v26 = vadd.f32 %v2406_v20, %v1678_v25  ;;  %v2385_v57 = vld [vmem:[%s3399_s12] ss:$0 sm:$0xff] }
 0x423   : > { %v1611_v60 = vrot.slane %v1606_v8, 4  ;;  %v1602_v21 = vperm.slane %v1596_v59, %v3048_v36  ;;  %v1609_v61 = vrot.slane %v1590_v58, 4  ;;  %v1614_v2 = vsel %vm934_vm2, %v1606_v8, %v1613_v22  ;;  %v2241_v36 = vld [vmem:[%s3000_s28 + $0x8] sm:$0xff]  ;;  %s3398_s28 = scalar_lea.vmem [#allocation9], %s2950_s3 }
 0x424   : > { %1662 = vmatpush.bf16.msra.mxu1 %v2241_v36  ;;  %v1681_v27 = vsel %vm1680_vm8, %v2406_v20, %v1679_v26  ;;  %v2384_v50 = vld [vmem:[%s3398_s28] ss:$0 sm:$0xff] }
 0x425   : > { %v1612_v62 = vsel %vm934_vm2, %v1611_v60, %v1594_v15  ;;  %v1607_v63 = vrot.slane %v1602_v21, 4  ;;  %v1610_v0 = vsel %vm934_vm2, %v1602_v21, %v1609_v61  ;;  %1794 = vmatpush.bf16.msra.mxu3 %v2245_v55  ;;  %v2386_v21 = vld [vmem:[%s3400_s8] ss:$0 sm:$0xff] }
 0x426   : > { %1620 = vrot.lane.b32.xlu1 %v1612_v62, %s2711_s22  ;;  %1616 = vrot.lane.b32.xlu2 %v1610_v0, %s2712_s11 }
 0x427   : > { %v1608_v1 = vsel %vm934_vm2, %v1607_v63, %v1590_v58 }
 0x428   : > { %1663 = vmatpush.bf16.msra.mxu1 %v2240_v3 }
 0x429   : > { %1795 = vmatpush.bf16.msra.mxu3 %v2244_v56 }
 0x42e   : > { %1624 = vrot.lane.b32.xlu2 %v1614_v2, %s2713_s25 }
 0x480   : > { %v1617_v5 = vpop.permute.xlu2 %1616 }
 0x481   : > { %v1627_v6 = vsel %vm1303_vm3, %v1608_v1, %v1617_v5 }
 0x488   : > { %v1625_v7 = vpop.permute.xlu2 %1624 }
 0x498   : > { %v1621_v38 = vpop.permute.xlu1 %1620 }
 0x499   : > { %v1629_v9 = vsel %vm1628_vm6, %v1627_v6, %v1621_v38 }
 0x49a   : > { %v1631_v10 = vsel %vm1630_vm7, %v1629_v9, %v1625_v7 }
 0x49b   : > { %v1632_v12 = vpack.c.bf16 %v1631_v10, %v1631_v10 }
 0x49d   : > { %2202 = vmatmul.msk.bf16.vlgmr.msra.gmra.mxu1 %vm906_vm1, %v1632_v12 }
 0x51a   : > { %v1665_v14 = vpop.f32.mrf.mxu1 }
 0x51b   : > { %v1666_v11 = vadd.f32 %v2382_v13, %v1665_v14 }
 0x51d   : > { %v1669_v16 = vadd.f32 %v1666_v11, %v3023_v4 }
 0x51f   : > { %v1672_v17 = vsel %vm906_vm1, %v1669_v16, 0.0 }
 0x520   : > { %1673 = vadd.xlane.f32.xlu2 %v1672_v17 }
 0x522   : > { %v1667_v18 = vpop.f32.mrf.mxu1 }
 0x523   : > { %v2388_v18 = vld [vmem:[%s739_s4] ss:$0 sm:$0xff] }
 0x593   : > { %v1674_v28 = vpop.xlane.xlu2 %1673 }
 0x594   : > { %v1682_v29 = vmul.f32 %v1681_v27, %v1674_v28 }
 0x596   : > { %v1683_v4 = vsub.f32 %v1669_v16, %v1682_v29  ;;  %v2387_v16 = vld [vmem:[%s869_s10] ss:$0 sm:$0xff] }
 0x598   : > { %v1684_v30 = vmul.f32 %v1683_v4, %v1683_v4 }
 0x59a   : > { %v1685_v31 = vsel %vm906_vm1, %v1684_v30, 0.0 }
 0x59b   : > { %1686 = vadd.xlane.f32.xlu1 %v1685_v31 }
 0x60e   : > { %v1687_v35 = vpop.xlane.xlu1 %1686 }
 0x60f   : > { %v1688_v37 = vmul.f32 %v1687_v35, %v1681_v27 }
 0x611   : > { %v1689_v40 = vadd.f32 1e-05, %v1688_v37 }
 0x613   : > { %2407 = vrsqrt.f32 %v1689_v40  ;;  %vm1696_vm10 = vweird.f32 %v1689_v40 }
 0x619   : > { %v2408_v41 = vpop.eup %2407 }
 0x61a   : > { %v1691_v42 = vmul.f32 %v2408_v41, %v1689_v40  ;;  %vm1697_vm9 = vweird.f32 %v2408_v41 }
 0x61b   : > { %vm1698_vm11 = vmor %vm1696_vm10, %vm1697_vm9 }
 0x61c   : > { %v1692_v43 = vmul.f32 %v2408_v41, %v1691_v42 }
 0x61e   : > { %v1693_v44 = vmul.f32 0.5, %v1692_v43 }
 0x620   : > { %v1694_v46 = vsub.f32 1.5, %v1693_v44 }
 0x622   : > { %v1695_v47 = vmul.f32 %v2408_v41, %v1694_v46 }
 0x624   : > { %v1699_v49 = vsel %vm1698_vm11, %v2408_v41, %v1695_v47 }
 0x625   : > { %v1700_v51 = vmul.f32 %v1699_v49, %v1683_v4 }
 0x627   : > { %v1704_v52 = vmul.f32 %v2383_v48, %v1700_v51 }
 0x629   : > { %v1708_v53 = vadd.f32 %v2384_v50, %v1704_v52 }
 0x62b   : > { %v1709_v54 = vpack.c.bf16 %v1708_v53, %v1708_v53 }
 0x62d   : > { %2211 = vmatmul.msk.bf16.vlgmr.msra.gmra.mxu2 %vm906_vm1, %v1709_v54 }
 0x6b0   : > { %v1742_v8 = vpop.f32.mrf.mxu2 }
 0x6b1   : > { %v1743_v58 = vadd.f32 %v2385_v57, %v1742_v8 }
 0x6b3   : > { %v1746_v59 = vmax.f32 %v1743_v58, 0.0 }
 0x6b5   : > { %v1747_v15 = vpack.c.bf16 %v1746_v59, %v1746_v59 }
 0x6b7   : > { %2228 = vmatmul.msk.bf16.vlgmr.msra.gmra.mxu3 %vm1784_vm12, %v1747_v15 }
 0x6b8   : > { %v1744_v60 = vpop.f32.mrf.mxu2 }
 0x73a   : > { %v1797_v61 = vpop.f32.mrf.mxu3 }
 0x73b   : > { %v1798_v62 = vadd.f32 %v2386_v21, %v1797_v61 }
 0x73d   : > { %v1801_v63 = vadd.f32 %v1798_v62, %v1708_v53 }
 0x73f   : > { %v1804_v0 = vsel %vm906_vm1, %v1801_v63, 0.0 }
 0x740   : > { %1805 = vadd.xlane.f32.xlu0 %v1804_v0 }
 0x742   : > { %v1799_v1 = vpop.f32.mrf.mxu3 }
 0x7b3   : > { %v1806_v22 = vpop.xlane.xlu0 %1805 }
 0x7b4   : > { %v1807_v2 = vmul.f32 %v1806_v22, %v1681_v27 }
 0x7b6   : > { %v1808_v36 = vsub.f32 %v1801_v63, %v1807_v2 }
 0x7b8   : > { %v1809_v3 = vmul.f32 %v1808_v36, %v1808_v36 }
 0x7ba   : > { %v1810_v5 = vsel %vm906_vm1, %v1809_v3, 0.0 }
 0x7bb   : > { %1811 = vadd.xlane.f32.xlu0 %v1810_v5 }
 0x82e   : > { %v1812_v6 = vpop.xlane.xlu0 %1811 }
 0x82f   : > { %v1813_v38 = vmul.f32 %v1812_v6, %v1681_v27 }
 0x831   : > { %v1814_v7 = vadd.f32 1e-05, %v1813_v38 }
 0x833   : > { %2409 = vrsqrt.f32 %v1814_v7  ;;  %vm1821_vm14 = vweird.f32 %v1814_v7 }
 0x839   : > { %v2410_v9 = vpop.eup %2409 }
 0x83a   : > { %v1816_v10 = vmul.f32 %v2410_v9, %v1814_v7  ;;  %vm1822_vm13 = vweird.f32 %v2410_v9 }
 0x83b   : > { %vm1823_vm15 = vmor %vm1821_vm14, %vm1822_vm13 }
 0x83c   : > { %v1817_v12 = vmul.f32 %v2410_v9, %v1816_v10 }
 0x83e   : > { %v1818_v13 = vmul.f32 0.5, %v1817_v12 }
 0x840   : > { %v1819_v14 = vsub.f32 1.5, %v1818_v13 }
 0x842   : > { %v1820_v11 = vmul.f32 %v2410_v9, %v1819_v14 }
 0x844   : > { %v1824_v17 = vsel %vm1823_vm15, %v2410_v9, %v1820_v11 }
 0x845   : > { %v1825_v19 = vmul.f32 %v1824_v17, %v1808_v36 }
 0x847   : > { %v1829_v20 = vmul.f32 %v2387_v16, %v1825_v19  ;;  %1838 = sbr.rel (%p2229_p3) target bundleno = 2382 (0x94e), region = 120 }
 0x849   : > { %v1833_v23 = vadd.f32 %v2388_v18, %v1829_v20 }
 0x84b   : > { %1834 = vst.msk [vmem:[#allocation2] sm:$0xff] %vm906_vm1, %v1833_v23 }
 0x84c   : > { %1857 = vmatpush.msra.mxu0 %v1833_v23  ;;  %vm1889_vm0 = vcmask 57344   ;;  %v1865_v24 = vld [vmem:[%s3402_s19 + $0x18] sm:$0xff]  ;;  %v1864_v25 = vld [vmem:[%s3402_s19 + $0x10] sm:$0xff]  ;;  %v1863_v27 = vld [vmem:[%s3402_s19 + $0x8] sm:$0xff] }
 0x84d   : > { %2230 = vmatmul.msk.f32.vlgmr.msra.gmra.mxu0 %vm1303_vm3, %v3133_v45  ;;  %v1890_v26 = vsel %vm1889_vm0, %v3133_v45, 0.0  ;;  %1881 = vmatpush.msra.mxu1 %v1865_v24  ;;  %v1862_v28 = vld [vmem:[%s3402_s19] sm:$0xff]  ;;  %v1909_v43 = vld [vmem:[#allocation3] sm:$0x1] }
 0x84e   : > { %1891 = vadd.xlane.f32.xlu0 %v1890_v26 }
 0x84f   : > { %1882 = vmatpush.msra.mxu1 %v1864_v25 }
 0x851   : > { %1883 = vmatpush.msra.mxu1 %v1863_v27 }
 0x853   : > { %1884 = vmatpush.msra.mxu1 %v1862_v28 }
 0x8c1   : > { %v1892_v4 = vpop.xlane.xlu0 %1891 }
 0x8c2   : > { %v1893_v30 = vmax.f32 %v1892_v4, 1.0 }
 0x8c4   : > { %2411 = vrcp.f32 %v1893_v30  ;;  %vm1899_vm2 = vweird.f32 %v1893_v30  ;;  %v1905_v34 = vand.u32 2147483648, %v1893_v30  ;;  %v1903_v37 = vand.u32 2147483647, %v1893_v30 }
 0x8c6   : > { %v1906_v39 = vor.u32 1.1754944e-38, %v1905_v34  ;;  %vm1904_vm5 = vcmp.eq.f32.partialorder %v1903_v37, 8.507059e+37 }
 0x8ca   : > { %v1859_v29 = vpop.f32.mrf.mxu0  ;;  %v2412_v45 = vpop.eup %2411 }
 0x8cb   : > { %2231 = vmatmul.msk.f32.vlgmr.msra.gmra.mxu1 %vm906_vm1, %v1859_v29  ;;  %v1895_v31 = vmul.f32 %v2412_v45, %v1893_v30  ;;  %vm1900_vm3 = vweird.f32 %v2412_v45  ;;  %vm1911_vm1 = vcmask 0  }
 0x8cc   : > { %vm1901_vm4 = vmor %vm1899_vm2, %vm1900_vm3 }
 0x8cd   : > { %v1896_v32 = vsub.f32 1.0, %v1895_v31 }
 0x8cf   : > { %v1897_v33 = vmul.f32 %v2412_v45, %v1896_v32 }
 0x8d1   : > { %v1898_v35 = vadd.f32 %v2412_v45, %v1897_v33 }
 0x8d3   : > { %v1902_v40 = vsel %vm1901_vm4, %v2412_v45, %v1898_v35 }
 0x8d4   : > { %v1907_v42 = vsel %vm1904_vm5, %v1906_v39, %v1902_v40 }
 0x948   : > { %v1886_v41 = vpop.f32.mrf.mxu1 }
 0x949   : > { %v1908_v44 = vmul.f32 %v1907_v42, %v1886_v41 }
 0x94b   : > { %v1910_v46 = vadd.f32 %v1909_v43, %v1908_v44 }
 0x94d   : > { %1912 = vst.msk [vmem:[%s872_s14] sm:$0x1] %vm1911_vm1, %v1910_v46 }
 0x94e PF: > { %s40_s29 = sadd.s32 1, %s2701_s29   ;;  %s3404_s22 = sld [smem:[#allocation19_spill]] }
 0x94f   : > { %p37_p4 = scmp.ge.s32.totalorder %s40_s29, 6   ;;  %s3405_s25 = sld [smem:[#allocation23_spill]] }
 0x950   : > { %s3406_s27 = sld [smem:[#allocation20_spill]]  ;;  %s3409_s23 = smov %s2677_s24 }
 0x951   : > { %s3407_s11 = sld [smem:[#allocation21_spill]]  ;;  %s3411_s26 = smov %s2693_s15 }
 0x952   : > { %s3408_s28 = sld [smem:[#allocation22_spill]] }
 0x953   :  { %39 = sbr.rel (!%p37_p4) target bundleno = 26 (0x1a), region = 225 }
 0x954   : > { %s3410_s24 = smov %s3404_s22 }
 0x957   : > { %s3412_s15 = smov %s3407_s11 }
 0x958   :  { %1930 = vsyncpa [#allocation5], 1 }
 0x959   :  { %1932 = vsyncpa [#allocation5 + $0x1], 1 }
 0x95a   :  { %1933 = vsyncpa [#allocation7], 1 }
 0x95b   :  { %1935 = vsyncpa [#allocation7 + $0x1], 1 }
 0x95c   :  { %1936 = vsyncpa [#allocation10], 1 }
 0x95d   :  { %1938 = vsyncpa [#allocation10 + $0x1], 1 }
 0x95e   :  { %1939 = vsyncpa [#allocation13], 1 }
 0x95f   :  { %1941 = vsyncpa [#allocation13 + $0x1], 1 }

</bundles_post_ra>
